<compile_context>
chip_gen: v7x
topology: tpu7x:2x2x1
jax: 0.10.0
libtpu: 0.0.40
codegen_flags: <defaults>
</compile_context>

<pallas_src>
import functools

import jax
import jax.numpy as jnp
from jax import lax
from jax.experimental import pallas as pl
from jax.experimental.pallas import tpu as pltpu

_LN_EPS = 1e-5  # PyTorch nn.LayerNorm default eps


def _layernorm(x, gamma, beta):
    mu = jnp.mean(x, axis=-1, keepdims=True)
    var = jnp.mean((x - mu) ** 2, axis=-1, keepdims=True)
    return (x - mu) * lax.rsqrt(var + _LN_EPS) * gamma + beta


# ------------------------------ fused kernel --------------------------------


def vit_kernel(x_ref,
               ln1_g_ref, ln1_b_ref, wqkv_ref, wo_ref,
               ln2_g_ref, ln2_b_ref, w1_ref, fb1_ref, w2_ref, fb2_ref,
               ng_ref, nb_ref, wh_ref, bh_ref,
               o_ref,
               x_sc, qkv_sc, attn_sc,
               *, heads, dim_head, n_tokens, batch_tile):
    bB, N, dh = batch_tile, n_tokens, dim_head
    M = bB * N
    D = x_ref.shape[-1]
    inner = heads * dh
    layer = pl.program_id(1)

    # NOTE: the residual carry in x_sc requires the layer grid axis to stay the
    # innermost axis and "arbitrary" (sequential).  Do not reorder / parallelize.

    # --- layer 0: load the (posemb-added) bf16 input into the f32 residual ---
    @pl.when(layer == 0)
    def _():
        x_sc[...] = x_ref[...].reshape(M, D).astype(jnp.float32)

    x = x_sc[...]                                       # (M, D) f32 residual

    # ----------------- attention block (pre-LN, residual) -------------------
    xn = _layernorm(x, ln1_g_ref[0], ln1_b_ref[0]).astype(jnp.bfloat16)
    # One fused QKV matmul for all heads (attention scale folded into Q cols).
    qkv_sc[...] = jnp.dot(xn, wqkv_ref[0],
                          preferred_element_type=jnp.float32).astype(jnp.bfloat16)

    # Per-head softmax-attention.  Static loop (static lane offsets); per-head
    # data flows through the VMEM scratches so the live set stays one head wide.
    # TODO(synk): for dim_head=64 configs, process heads in pairs so the Q/K/V
    # slices and context stores land on 128-lane boundaries.
    for h in range(heads):
        q = qkv_sc[:, h * dh:(h + 1) * dh].reshape(bB, N, dh)
        k = qkv_sc[:, inner + h * dh:inner + (h + 1) * dh].reshape(bB, N, dh)
        v = qkv_sc[:, 2 * inner + h * dh:2 * inner + (h + 1) * dh].reshape(bB, N, dh)
        s = jnp.einsum("bnd,bmd->bnm", q, k,
                       preferred_element_type=jnp.float32)
        s = s - jnp.max(s, axis=-1, keepdims=True)      # stable softmax (f32)
        e = jnp.exp(s)
        p = e * pl.reciprocal(jnp.sum(e, axis=-1, keepdims=True), approx=True)
        o3 = jnp.einsum("bnm,bmd->bnd", p.astype(jnp.bfloat16), v,
                        preferred_element_type=jnp.float32)
        attn_sc[:, h * dh:(h + 1) * dh] = o3.reshape(M, dh).astype(jnp.bfloat16)

    # Single out-projection over the concatenated head outputs (K = inner).
    x = x + jnp.dot(attn_sc[...], wo_ref[0], preferred_element_type=jnp.float32)

    # ---------------- feed-forward block (pre-LN, residual) -----------------
    xn2 = _layernorm(x, ln2_g_ref[0], ln2_b_ref[0]).astype(jnp.bfloat16)
    h1 = jnp.dot(xn2, w1_ref[0], preferred_element_type=jnp.float32) + fb1_ref[0]
    # TODO(synk): PyTorch nn.GELU() default is exact erf-GELU; tanh approx is
    # used because it lowers reliably to the EUP (|err| ~ 1e-3).
    h1 = jax.nn.gelu(h1, approximate=True)
    ff = jnp.dot(h1.astype(jnp.bfloat16), w2_ref[0],
                 preferred_element_type=jnp.float32) + fb2_ref[0]
    x = x + ff
    x_sc[...] = x                                       # carry to next layer

    # --------- final norm + mean pool + classifier head (fused) -------------
    @pl.when(layer == pl.num_programs(1) - 1)
    def _():
        xf = _layernorm(x, ng_ref[...], nb_ref[...])    # (M, D)
        pooled = jnp.mean(xf.reshape(bB, N, D), axis=1)  # mean over tokens
        o_ref[...] = (jnp.dot(pooled.astype(jnp.bfloat16), wh_ref[...],
                              preferred_element_type=jnp.float32)
                      + bh_ref[...])


# ------------------------------- wrappers ------------------------------------


def _full_spec(shape):
    nd = len(shape)
    return pl.BlockSpec(shape, lambda b, l, _nd=nd: (0,) * _nd)


def _layer_spec(shape):
    # stacked per-layer tensor: leading depth axis, one layer per grid step.
    nd = len(shape)
    return pl.BlockSpec((1,) + tuple(shape[1:]),
                        lambda b, l, _nd=nd: (l,) + (0,) * (_nd - 1))


def _pick_batch_tile(batch, n_tokens, max_tokens=2048):
    """Pick the batch tile bB.

    Preference order (all candidates are either the full batch or divisors of
    `batch` that are multiples of 8, so blocks stay sublane-aligned):
      1. largest bB with bB*n_tokens <= max_tokens giving an EVEN tile count
         >= 2 (keeps both v7x TensorCores busy under "parallel" semantics),
      2. largest such bB with tile count >= 2,
      3. largest bB fitting the token budget,
      4. the smallest legal tile if nothing fits the budget (never silently
         exceed the intended VMEM budget by falling back to the full batch).
    """
    cands = [d for d in range(8, batch, 8) if batch % d == 0] + [batch]
    fitting = [d for d in cands if d * n_tokens <= max_tokens]
    if not fitting:
        return min(cands)
    even = [d for d in fitting if (batch // d) >= 2 and (batch // d) % 2 == 0]
    if even:
        return max(even)
    multi = [d for d in fitting if (batch // d) >= 2]
    if multi:
        return max(multi)
    return max(fitting)


def _vmem_limit_bytes(bB, N, D, inner, mlp, c_pad):
    """~2x per-layer weights (bf16, double-buffered) + scratches + io buffers
    + headroom.  Clamped to [32 MiB, 128 MiB]; on v7x keep configs such that
    the estimate stays under the 64 MiB physical VMEM."""
    M = bB * N
    layer_w_bf16 = 2 * (D * 3 * inner + inner * D + D * mlp + mlp * D)
    layer_f32 = 4 * (4 * D + mlp + D)                   # LN params + biases
    x_in = 2 * (bB * N * D) * 2                         # bf16 input block x2
    out_b = 2 * (bB * c_pad) * 4
    fixed = 2 * (2 * 4 * D + 2 * D * c_pad + 4 * c_pad)  # final norm + head
    scratch = 4 * M * D + 2 * M * 3 * inner + 2 * M * inner
    est = 2 * (layer_w_bf16 + layer_f32) + x_in + out_b + fixed + scratch
    return int(min(128 << 20, max(int(est * 1.25) + (8 << 20), 32 << 20)))


def posemb_sincos_1d(n, dim, temperature=10000.0, dtype=jnp.float32):
    assert dim % 2 == 0, "feature dimension must be multiple of 2 for sincos emb"
    pos = jnp.arange(n, dtype=jnp.float32)
    omega = jnp.arange(dim // 2, dtype=jnp.float32) / (dim // 2 - 1)
    omega = 1.0 / (temperature ** omega)
    ang = pos[:, None] * omega[None, :]
    return jnp.concatenate([jnp.sin(ang), jnp.cos(ang)], axis=1).astype(dtype)


def simple_vit_forward(x, prepared, *, heads, dim_head, num_classes,
                       max_tokens=2048):
    B, N, D = x.shape
    # TODO(synk): pad + mask tokens when N is not a multiple of 8 (keeps the
    # (M, dh) <-> (bB, N, dh) reshapes layout-preserving).
    assert N % 8 == 0, "token count must be a multiple of 8"
    depth = prepared["ln1_g"].shape[0]
    inner = heads * dim_head
    mlp = prepared["w1"].shape[-1]
    c_pad = prepared["wh"].shape[1]
    bB = _pick_batch_tile(B, N, max_tokens=max_tokens)
    assert B % bB == 0
    grid = (B // bB, depth)
    M = bB * N

    # posemb added in the wrapper; input passed bf16 so no f32 x block is
    # double-buffered across the whole layer loop.
    pe = posemb_sincos_1d(N, D)
    x_in = (x + pe[None]).astype(jnp.bfloat16)

    kern = functools.partial(vit_kernel, heads=heads, dim_head=dim_head,
                             n_tokens=N, batch_tile=bB)

    logits = pl.pallas_call(
        kern,
        out_shape=jax.ShapeDtypeStruct((B, c_pad), jnp.float32),
        grid=grid,
        in_specs=[
            pl.BlockSpec((bB, N, D), lambda b, l: (b, 0, 0)),
            _layer_spec(prepared["ln1_g"].shape),
            _layer_spec(prepared["ln1_b"].shape),
            _layer_spec(prepared["wqkv"].shape),
            _layer_spec(prepared["wo"].shape),
            _layer_spec(prepared["ln2_g"].shape),
            _layer_spec(prepared["ln2_b"].shape),
            _layer_spec(prepared["w1"].shape),
            _layer_spec(prepared["b1"].shape),
            _layer_spec(prepared["w2"].shape),
            _layer_spec(prepared["b2"].shape),
            _full_spec(prepared["norm_g"].shape),
            _full_spec(prepared["norm_b"].shape),
            _full_spec(prepared["wh"].shape),
            _full_spec(prepared["bh"].shape),
        ],
        out_specs=pl.BlockSpec((bB, c_pad), lambda b, l: (b, 0)),
        scratch_shapes=[
            pltpu.VMEM((M, D), jnp.float32),          # residual stream
            pltpu.VMEM((M, 3 * inner), jnp.bfloat16),  # fused QKV
            pltpu.VMEM((M, inner), jnp.bfloat16),      # concat head outputs
        ],
        compiler_params=pltpu.CompilerParams(
            dimension_semantics=("parallel", "arbitrary"),
            vmem_limit_bytes=_vmem_limit_bytes(bB, N, D, inner, mlp, c_pad)),
    )(x_in,
      prepared["ln1_g"], prepared["ln1_b"],
      prepared["wqkv"], prepared["wo"],
      prepared["ln2_g"], prepared["ln2_b"],
      prepared["w1"], prepared["b1"], prepared["w2"], prepared["b2"],
      prepared["norm_g"], prepared["norm_b"],
      prepared["wh"], prepared["bh"])
    return logits[:, :num_classes]                      # drop lane padding


# --------------------------- parameter handling ------------------------------


def init_params(key, *, dim, depth, heads, dim_head, mlp_dim, num_classes):
    """PyTorch-layout parameters (fp32, fused qkv, math orientation x @ W)."""
    inner = heads * dim_head
    layers = []
    for _ in range(depth):
        key, k1, k2, k3, k4 = jax.random.split(key, 5)
        layers.append(dict(
            attn_g=jnp.ones((dim,), jnp.float32),       # LayerNorm weight
            attn_b=jnp.zeros((dim,), jnp.float32),      # LayerNorm bias
            wqkv=0.02 * jax.random.normal(k1, (dim, inner * 3), jnp.float32),
            wout=0.02 * jax.random.normal(k2, (inner, dim), jnp.float32),
            ff_g=jnp.ones((dim,), jnp.float32),
            ff_b=jnp.zeros((dim,), jnp.float32),
            w1=0.02 * jax.random.normal(k3, (dim, mlp_dim), jnp.float32),
            b1=jnp.zeros((mlp_dim,), jnp.float32),
            w2=0.02 * jax.random.normal(k4, (mlp_dim, dim), jnp.float32),
            b2=jnp.zeros((dim,), jnp.float32),
        ))
    key, kh = jax.random.split(key)
    return dict(
        layers=layers,
        norm_g=jnp.ones((dim,), jnp.float32),
        norm_b=jnp.zeros((dim,), jnp.float32),
        wh=0.02 * jax.random.normal(kh, (dim, num_classes), jnp.float32),
        bh=jnp.zeros((num_classes,), jnp.float32),
    )


def prepare_params(params, *, heads, dim_head, num_classes):
    """Stack per-layer weights along a leading depth axis, fold the attention
    scale into the Q columns of the fused QKV weight, cast matmul weights to
    bf16, and pad the classifier head to 128 lanes."""
    inner = heads * dim_head
    dim = params["wh"].shape[0]
    scale = dim_head ** -0.5

    def stack(name):
        return jnp.stack([layer[name] for layer in params["layers"]], axis=0)

    wqkv = stack("wqkv")                                # (depth, dim, 3*inner)
    wqkv = wqkv.at[:, :, :inner].multiply(scale)        # fold attention scale
    wo = stack("wout")                                  # (depth, inner, dim)

    c_pad = max(128, -(-num_classes // 128) * 128)
    wh = jnp.zeros((dim, c_pad), jnp.float32).at[:, :num_classes].set(params["wh"])
    bh = jnp.zeros((1, c_pad), jnp.float32).at[0, :num_classes].set(params["bh"])

    return dict(
        ln1_g=stack("attn_g")[:, None, :],              # (depth, 1, dim) f32
        ln1_b=stack("attn_b")[:, None, :],
        wqkv=wqkv.astype(jnp.bfloat16),                 # (depth, dim, 3*inner)
        wo=wo.astype(jnp.bfloat16),                     # (depth, inner, dim)
        ln2_g=stack("ff_g")[:, None, :],
        ln2_b=stack("ff_b")[:, None, :],
        w1=stack("w1").astype(jnp.bfloat16),            # (depth, dim, mlp)
        b1=stack("b1")[:, None, :],                     # (depth, 1, mlp) f32
        w2=stack("w2").astype(jnp.bfloat16),            # (depth, mlp, dim)
        b2=stack("b2")[:, None, :],
        norm_g=params["norm_g"][None, :],               # (1, dim)
        norm_b=params["norm_b"][None, :],
        wh=wh.astype(jnp.bfloat16),                     # (dim, c_pad)
        bh=bh,                                          # (1, c_pad) f32
    )


# ------------------------- pure-JAX reference (f32) --------------------------


def simple_vit_reference(x, params, *, heads, dim_head):
    B, N, D = x.shape
    inner = heads * dim_head
    scale = dim_head ** -0.5
    x = x + posemb_sincos_1d(N, D)[None]
    for lyr in params["layers"]:
        xn = _layernorm(x, lyr["attn_g"], lyr["attn_b"])
        qkv = xn @ lyr["wqkv"]
        q, k, v = jnp.split(qkv, 3, axis=-1)
        def heads_first(t):
            return t.reshape(B, N, heads, dim_head).transpose(0, 2, 1, 3)
        q, k, v = map(heads_first, (q, k, v))
        dots = jnp.einsum("bhnd,bhmd->bhnm", q, k) * scale
        attn = jax.nn.softmax(dots, axis=-1)
        out = jnp.einsum("bhnm,bhmd->bhnd", attn, v)
        out = out.transpose(0, 2, 1, 3).reshape(B, N, inner)
        x = x + out @ lyr["wout"]
        xn2 = _layernorm(x, lyr["ff_g"], lyr["ff_b"])
        h1 = jax.nn.gelu(xn2 @ lyr["w1"] + lyr["b1"], approximate=False)
        x = x + h1 @ lyr["w2"] + lyr["b2"]
    x = _layernorm(x, params["norm_g"], params["norm_b"])
    return x.mean(axis=1) @ params["wh"] + params["bh"]


if __name__ == "__main__":
    # small config consistent with SimpleViT(num_classes, dim, depth, heads, mlp_dim, dim_head)
    B, N = 2, 8
    dim, depth, heads, dim_head, mlp_dim, num_classes = 32, 2, 4, 8, 64, 10

    key = jax.random.PRNGKey(0)
    key, kx = jax.random.split(key)
    x = jax.random.normal(kx, (B, N, dim), jnp.float32)

    params = init_params(key, dim=dim, depth=depth, heads=heads,
                         dim_head=dim_head, mlp_dim=mlp_dim,
                         num_classes=num_classes)
    prepared = prepare_params(params, heads=heads, dim_head=dim_head,
                              num_classes=num_classes)

    logits = simple_vit_forward(x, prepared, heads=heads, dim_head=dim_head,
                                num_classes=num_classes)
    logits = jax.block_until_ready(logits)
    assert logits.shape == (B, num_classes)

    # loose tolerance: kernel uses bf16 MXU operands, tanh-GELU and an approx
    # reciprocal in the softmax normalization.
    ref = jax.block_until_ready(
        simple_vit_reference(x, params, heads=heads, dim_head=dim_head))
    max_err = float(jnp.max(jnp.abs(logits - ref)))
    assert max_err < 5e-2, f"max abs error vs f32 reference: {max_err}"

    print("KERNEL_OK")
</pallas_src>

<mosaic_0001>
module attributes {stable_mosaic.version = 11 : i64} {
  func.func @vit_kernel(%arg0: i32, %arg1: i32, %arg2: memref<2x8x32xbf16, #tpu.memory_space<vmem>>, %arg3: memref<1x1x32xf32, #tpu.memory_space<vmem>>, %arg4: memref<1x1x32xf32, #tpu.memory_space<vmem>>, %arg5: memref<1x32x96xbf16, #tpu.memory_space<vmem>>, %arg6: memref<1x32x32xbf16, #tpu.memory_space<vmem>>, %arg7: memref<1x1x32xf32, #tpu.memory_space<vmem>>, %arg8: memref<1x1x32xf32, #tpu.memory_space<vmem>>, %arg9: memref<1x32x64xbf16, #tpu.memory_space<vmem>>, %arg10: memref<1x1x64xf32, #tpu.memory_space<vmem>>, %arg11: memref<1x64x32xbf16, #tpu.memory_space<vmem>>, %arg12: memref<1x1x32xf32, #tpu.memory_space<vmem>>, %arg13: memref<1x32xf32, #tpu.memory_space<vmem>>, %arg14: memref<1x32xf32, #tpu.memory_space<vmem>>, %arg15: memref<32x128xbf16, #tpu.memory_space<vmem>>, %arg16: memref<1x128xf32, #tpu.memory_space<vmem>>, %arg17: memref<2x128xf32, #tpu.memory_space<vmem>>, %arg18: memref<16x32xf32, #tpu.memory_space<vmem>>, %arg19: memref<16x96xbf16, #tpu.memory_space<vmem>>, %arg20: memref<16x32xbf16, #tpu.memory_space<vmem>>) attributes {dimension_semantics = [#tpu.dimension_semantics<parallel>, #tpu.dimension_semantics<arbitrary>], iteration_bounds = array<i64: 1, 2>, scalar_prefetch = 0 : i64, scratch_operands = 3 : i64, tpu.core_type = #tpu.core_type<tc>, window_params = [{transform_indices = @transform_0, window_bounds = array<i64: 2, 8, 32>}, {transform_indices = @transform_1, window_bounds = array<i64: 1, 1, 32>}, {transform_indices = @transform_2, window_bounds = array<i64: 1, 1, 32>}, {transform_indices = @transform_3, window_bounds = array<i64: 1, 32, 96>}, {transform_indices = @transform_4, window_bounds = array<i64: 1, 32, 32>}, {transform_indices = @transform_5, window_bounds = array<i64: 1, 1, 32>}, {transform_indices = @transform_6, window_bounds = array<i64: 1, 1, 32>}, {transform_indices = @transform_7, window_bounds = array<i64: 1, 32, 64>}, {transform_indices = @transform_8, window_bounds = array<i64: 1, 1, 64>}, {transform_indices = @transform_9, window_bounds = array<i64: 1, 64, 32>}, {transform_indices = @transform_10, window_bounds = array<i64: 1, 1, 32>}, {pipeline_mode = #tpu.pipeline_mode<synchronous>, transform_indices = @transform_11, window_bounds = array<i64: 1, 32>}, {pipeline_mode = #tpu.pipeline_mode<synchronous>, transform_indices = @transform_12, window_bounds = array<i64: 1, 32>}, {pipeline_mode = #tpu.pipeline_mode<synchronous>, transform_indices = @transform_13, window_bounds = array<i64: 32, 128>}, {pipeline_mode = #tpu.pipeline_mode<synchronous>, transform_indices = @transform_14, window_bounds = array<i64: 1, 128>}, {transform_indices = @transform_15, window_bounds = array<i64: 2, 128>}]} {
    %c0_i32 = arith.constant 0 : i32
    %0 = arith.cmpi eq, %arg1, %c0_i32 : i32
    %1 = arith.extui %0 : i1 to i32
    %c0_i32_0 = arith.constant 0 : i32
    %2 = arith.cmpi ne, %1, %c0_i32_0 : i32
    scf.if %2 {
      %c0_93 = arith.constant 0 : index
      %c0_94 = arith.constant 0 : index
      %c0_95 = arith.constant 0 : index
      %189 = vector.load %arg2[%c0_93, %c0_94, %c0_95] : memref<2x8x32xbf16, #tpu.memory_space<vmem>>, vector<2x8x32xbf16>
      %190 = vector.shape_cast %189 : vector<2x8x32xbf16> to vector<16x32xbf16>
      %191 = arith.extf %190 : vector<16x32xbf16> to vector<16x32xf32>
      %c0_96 = arith.constant 0 : index
      %c0_97 = arith.constant 0 : index
      %192 = vector.load %arg18[%c0_96, %c0_97] : memref<16x32xf32, #tpu.memory_space<vmem>>, vector<16x32xf32>
      tpu.vector_store %arg18[%c0_96, %c0_97], %191 {strides = array<i32>} : memref<16x32xf32, #tpu.memory_space<vmem>>, vector<16x32xf32>,
    } else {
    }
    %c0 = arith.constant 0 : index
    %c0_1 = arith.constant 0 : index
    %3 = vector.load %arg18[%c0, %c0_1] : memref<16x32xf32, #tpu.memory_space<vmem>>, vector<16x32xf32>
    %c0_2 = arith.constant 0 : index
    %c0_3 = arith.constant 0 : index
    %c0_4 = arith.constant 0 : index
    %4 = vector.load %arg3[%c0_2, %c0_3, %c0_4] : memref<1x1x32xf32, #tpu.memory_space<vmem>>, vector<1x1x32xf32>
    %5 = vector.shape_cast %4 : vector<1x1x32xf32> to vector<1x32xf32>
    %c0_5 = arith.constant 0 : index
    %c0_6 = arith.constant 0 : index
    %c0_7 = arith.constant 0 : index
    %6 = vector.load %arg4[%c0_5, %c0_6, %c0_7] : memref<1x1x32xf32, #tpu.memory_space<vmem>>, vector<1x1x32xf32>
    %7 = vector.shape_cast %6 : vector<1x1x32xf32> to vector<1x32xf32>
    %cst = arith.constant dense<0.000000e+00> : vector<16xf32>
    %8 = vector.multi_reduction <add>, %3, %cst [1] : vector<16x32xf32> to vector<16xf32>
    %9 = vector.shape_cast %8 : vector<16xf32> to vector<16x1xf32>
    %cst_8 = arith.constant 3.200000e+01 : f32
    %10 = vector.broadcast %cst_8 : f32 to vector<16x1xf32>
    %11 = arith.divf %9, %10 : vector<16x1xf32>
    %12 = vector.broadcast %11 : vector<16x1xf32> to vector<16x32xf32>
    %13 = arith.subf %3, %12 : vector<16x32xf32>
    %14 = arith.mulf %13, %13 : vector<16x32xf32>
    %cst_9 = arith.constant dense<0.000000e+00> : vector<16xf32>
    %15 = vector.multi_reduction <add>, %14, %cst_9 [1] : vector<16x32xf32> to vector<16xf32>
    %16 = vector.shape_cast %15 : vector<16xf32> to vector<16x1xf32>
    %cst_10 = arith.constant 3.200000e+01 : f32
    %17 = vector.broadcast %cst_10 : f32 to vector<16x1xf32>
    %18 = arith.divf %16, %17 : vector<16x1xf32>
    %19 = vector.broadcast %11 : vector<16x1xf32> to vector<16x32xf32>
    %20 = arith.subf %3, %19 : vector<16x32xf32>
    %cst_11 = arith.constant 9.99999974E-6 : f32
    %21 = vector.broadcast %cst_11 : f32 to vector<16x1xf32>
    %22 = arith.addf %18, %21 : vector<16x1xf32>
    %23 = math.rsqrt %22 : vector<16x1xf32>
    %24 = vector.broadcast %23 : vector<16x1xf32> to vector<16x32xf32>
    %25 = arith.mulf %20, %24 : vector<16x32xf32>
    %26 = vector.broadcast %5 : vector<1x32xf32> to vector<16x32xf32>
    %27 = arith.mulf %25, %26 : vector<16x32xf32>
    %28 = vector.broadcast %7 : vector<1x32xf32> to vector<16x32xf32>
    %29 = arith.addf %27, %28 : vector<16x32xf32>
    %30 = arith.truncf %29 : vector<16x32xf32> to vector<16x32xbf16>
    %c0_12 = arith.constant 0 : index
    %c0_13 = arith.constant 0 : index
    %c0_14 = arith.constant 0 : index
    %31 = vector.load %arg5[%c0_12, %c0_13, %c0_14] : memref<1x32x96xbf16, #tpu.memory_space<vmem>>, vector<1x32x96xbf16>
    %32 = vector.shape_cast %31 : vector<1x32x96xbf16> to vector<32x96xbf16>
    %cst_15 = arith.constant dense<0.000000e+00> : vector<16x96xf32>
    %33 = tpu.matmul %30, %32, %cst_15 {dimension_numbers = #tpu.dot_dimension_numbers<[1], [0], [0], [1], [0, 0, 1, 1], [], []>} : vector<16x32xbf16>, vector<32x96xbf16>, vector<16x96xf32> -> vector<16x96xf32>
    %34 = arith.truncf %33 : vector<16x96xf32> to vector<16x96xbf16>
    %c0_16 = arith.constant 0 : index
    %c0_17 = arith.constant 0 : index
    %35 = vector.load %arg19[%c0_16, %c0_17] : memref<16x96xbf16, #tpu.memory_space<vmem>>, vector<16x96xbf16>
    tpu.vector_store %arg19[%c0_16, %c0_17], %34 {strides = array<i32>} : memref<16x96xbf16, #tpu.memory_space<vmem>>, vector<16x96xbf16>,
    %c0_18 = arith.constant 0 : index
    %c0_19 = arith.constant 0 : index
    %36 = vector.load %arg19[%c0_18, %c0_19] : memref<16x96xbf16, #tpu.memory_space<vmem>>, vector<16x8xbf16>
    %37 = vector.shape_cast %36 : vector<16x8xbf16> to vector<2x8x8xbf16>
    %c0_20 = arith.constant 0 : index
    %c32 = arith.constant 32 : index
    %38 = vector.load %arg19[%c0_20, %c32] : memref<16x96xbf16, #tpu.memory_space<vmem>>, vector<16x8xbf16>
    %39 = vector.shape_cast %38 : vector<16x8xbf16> to vector<2x8x8xbf16>
    %c0_21 = arith.constant 0 : index
    %c64 = arith.constant 64 : index
    %40 = vector.load %arg19[%c0_21, %c64] : memref<16x96xbf16, #tpu.memory_space<vmem>>, vector<16x8xbf16>
    %41 = vector.shape_cast %40 : vector<16x8xbf16> to vector<2x8x8xbf16>
    "tpu.trace_start"() <{level = 10 : i32, message = "bnd,bmd->bnm"}> : () -> ()
    %cst_22 = arith.constant dense<0.000000e+00> : vector<2x8x8xf32>
    %42 = tpu.matmul %37, %39, %cst_22 {dimension_numbers = #tpu.dot_dimension_numbers<[2], [2], [1], [1], [0, 0, 0, 1, 1, 1], [0], [0]>} : vector<2x8x8xbf16>, vector<2x8x8xbf16>, vector<2x8x8xf32> -> vector<2x8x8xf32>
    "tpu.trace_stop"() : () -> ()
    %cst_23 = arith.constant dense<0xFF800000> : vector<2x8xf32>
    %43 = vector.multi_reduction <maximumf>, %42, %cst_23 [2] : vector<2x8x8xf32> to vector<2x8xf32>
    %44 = vector.shape_cast %43 : vector<2x8xf32> to vector<2x8x1xf32>
    %45 = vector.broadcast %44 : vector<2x8x1xf32> to vector<2x8x8xf32>
    %46 = arith.subf %42, %45 : vector<2x8x8xf32>
    %47 = math.exp %46 : vector<2x8x8xf32>
    %cst_24 = arith.constant dense<0.000000e+00> : vector<2x8xf32>
    %48 = vector.multi_reduction <add>, %47, %cst_24 [2] : vector<2x8x8xf32> to vector<2x8xf32>
    %49 = vector.shape_cast %48 : vector<2x8xf32> to vector<2x8x1xf32>
    %50 = tpu.reciprocal %49 {approx = true} : vector<2x8x1xf32> -> vector<2x8x1xf32>
    %51 = vector.broadcast %50 : vector<2x8x1xf32> to vector<2x8x8xf32>
    %52 = arith.mulf %47, %51 : vector<2x8x8xf32>
    %53 = arith.truncf %52 : vector<2x8x8xf32> to vector<2x8x8xbf16>
    "tpu.trace_start"() <{level = 10 : i32, message = "bnm,bmd->bnd"}> : () -> ()
    %cst_25 = arith.constant dense<0.000000e+00> : vector<2x8x8xf32>
    %54 = tpu.matmul %53, %41, %cst_25 {dimension_numbers = #tpu.dot_dimension_numbers<[2], [1], [1], [2], [0, 0, 0, 1, 1, 2], [0], [0]>} : vector<2x8x8xbf16>, vector<2x8x8xbf16>, vector<2x8x8xf32> -> vector<2x8x8xf32>
    "tpu.trace_stop"() : () -> ()
    %55 = vector.shape_cast %54 : vector<2x8x8xf32> to vector<16x8xf32>
    %56 = arith.truncf %55 : vector<16x8xf32> to vector<16x8xbf16>
    %c0_26 = arith.constant 0 : index
    %c0_27 = arith.constant 0 : index
    %57 = vector.load %arg20[%c0_26, %c0_27] : memref<16x32xbf16, #tpu.memory_space<vmem>>, vector<16x8xbf16>
    tpu.vector_store %arg20[%c0_26, %c0_27], %56 {strides = array<i32>} : memref<16x32xbf16, #tpu.memory_space<vmem>>, vector<16x8xbf16>,
    %c0_28 = arith.constant 0 : index
    %c8 = arith.constant 8 : index
    %58 = vector.load %arg19[%c0_28, %c8] : memref<16x96xbf16, #tpu.memory_space<vmem>>, vector<16x8xbf16>
    %59 = vector.shape_cast %58 : vector<16x8xbf16> to vector<2x8x8xbf16>
    %c0_29 = arith.constant 0 : index
    %c40 = arith.constant 40 : index
    %60 = vector.load %arg19[%c0_29, %c40] : memref<16x96xbf16, #tpu.memory_space<vmem>>, vector<16x8xbf16>
    %61 = vector.shape_cast %60 : vector<16x8xbf16> to vector<2x8x8xbf16>
    %c0_30 = arith.constant 0 : index
    %c72 = arith.constant 72 : index
    %62 = vector.load %arg19[%c0_30, %c72] : memref<16x96xbf16, #tpu.memory_space<vmem>>, vector<16x8xbf16>
    %63 = vector.shape_cast %62 : vector<16x8xbf16> to vector<2x8x8xbf16>
    "tpu.trace_start"() <{level = 10 : i32, message = "bnd,bmd->bnm"}> : () -> ()
    %cst_31 = arith.constant dense<0.000000e+00> : vector<2x8x8xf32>
    %64 = tpu.matmul %59, %61, %cst_31 {dimension_numbers = #tpu.dot_dimension_numbers<[2], [2], [1], [1], [0, 0, 0, 1, 1, 1], [0], [0]>} : vector<2x8x8xbf16>, vector<2x8x8xbf16>, vector<2x8x8xf32> -> vector<2x8x8xf32>
    "tpu.trace_stop"() : () -> ()
    %cst_32 = arith.constant dense<0xFF800000> : vector<2x8xf32>
    %65 = vector.multi_reduction <maximumf>, %64, %cst_32 [2] : vector<2x8x8xf32> to vector<2x8xf32>
    %66 = vector.shape_cast %65 : vector<2x8xf32> to vector<2x8x1xf32>
    %67 = vector.broadcast %66 : vector<2x8x1xf32> to vector<2x8x8xf32>
    %68 = arith.subf %64, %67 : vector<2x8x8xf32>
    %69 = math.exp %68 : vector<2x8x8xf32>
    %cst_33 = arith.constant dense<0.000000e+00> : vector<2x8xf32>
    %70 = vector.multi_reduction <add>, %69, %cst_33 [2] : vector<2x8x8xf32> to vector<2x8xf32>
    %71 = vector.shape_cast %70 : vector<2x8xf32> to vector<2x8x1xf32>
    %72 = tpu.reciprocal %71 {approx = true} : vector<2x8x1xf32> -> vector<2x8x1xf32>
    %73 = vector.broadcast %72 : vector<2x8x1xf32> to vector<2x8x8xf32>
    %74 = arith.mulf %69, %73 : vector<2x8x8xf32>
    %75 = arith.truncf %74 : vector<2x8x8xf32> to vector<2x8x8xbf16>
    "tpu.trace_start"() <{level = 10 : i32, message = "bnm,bmd->bnd"}> : () -> ()
    %cst_34 = arith.constant dense<0.000000e+00> : vector<2x8x8xf32>
    %76 = tpu.matmul %75, %63, %cst_34 {dimension_numbers = #tpu.dot_dimension_numbers<[2], [1], [1], [2], [0, 0, 0, 1, 1, 2], [0], [0]>} : vector<2x8x8xbf16>, vector<2x8x8xbf16>, vector<2x8x8xf32> -> vector<2x8x8xf32>
    "tpu.trace_stop"() : () -> ()
    %77 = vector.shape_cast %76 : vector<2x8x8xf32> to vector<16x8xf32>
    %78 = arith.truncf %77 : vector<16x8xf32> to vector<16x8xbf16>
    %c0_35 = arith.constant 0 : index
    %c8_36 = arith.constant 8 : index
    %79 = vector.load %arg20[%c0_35, %c8_36] : memref<16x32xbf16, #tpu.memory_space<vmem>>, vector<16x8xbf16>
    tpu.vector_store %arg20[%c0_35, %c8_36], %78 {strides = array<i32>} : memref<16x32xbf16, #tpu.memory_space<vmem>>, vector<16x8xbf16>,
    %c0_37 = arith.constant 0 : index
    %c16 = arith.constant 16 : index
    %80 = vector.load %arg19[%c0_37, %c16] : memref<16x96xbf16, #tpu.memory_space<vmem>>, vector<16x8xbf16>
    %81 = vector.shape_cast %80 : vector<16x8xbf16> to vector<2x8x8xbf16>
    %c0_38 = arith.constant 0 : index
    %c48 = arith.constant 48 : index
    %82 = vector.load %arg19[%c0_38, %c48] : memref<16x96xbf16, #tpu.memory_space<vmem>>, vector<16x8xbf16>
    %83 = vector.shape_cast %82 : vector<16x8xbf16> to vector<2x8x8xbf16>
    %c0_39 = arith.constant 0 : index
    %c80 = arith.constant 80 : index
    %84 = vector.load %arg19[%c0_39, %c80] : memref<16x96xbf16, #tpu.memory_space<vmem>>, vector<16x8xbf16>
    %85 = vector.shape_cast %84 : vector<16x8xbf16> to vector<2x8x8xbf16>
    "tpu.trace_start"() <{level = 10 : i32, message = "bnd,bmd->bnm"}> : () -> ()
    %cst_40 = arith.constant dense<0.000000e+00> : vector<2x8x8xf32>
    %86 = tpu.matmul %81, %83, %cst_40 {dimension_numbers = #tpu.dot_dimension_numbers<[2], [2], [1], [1], [0, 0, 0, 1, 1, 1], [0], [0]>} : vector<2x8x8xbf16>, vector<2x8x8xbf16>, vector<2x8x8xf32> -> vector<2x8x8xf32>
    "tpu.trace_stop"() : () -> ()
    %cst_41 = arith.constant dense<0xFF800000> : vector<2x8xf32>
    %87 = vector.multi_reduction <maximumf>, %86, %cst_41 [2] : vector<2x8x8xf32> to vector<2x8xf32>
    %88 = vector.shape_cast %87 : vector<2x8xf32> to vector<2x8x1xf32>
    %89 = vector.broadcast %88 : vector<2x8x1xf32> to vector<2x8x8xf32>
    %90 = arith.subf %86, %89 : vector<2x8x8xf32>
    %91 = math.exp %90 : vector<2x8x8xf32>
    %cst_42 = arith.constant dense<0.000000e+00> : vector<2x8xf32>
    %92 = vector.multi_reduction <add>, %91, %cst_42 [2] : vector<2x8x8xf32> to vector<2x8xf32>
    %93 = vector.shape_cast %92 : vector<2x8xf32> to vector<2x8x1xf32>
    %94 = tpu.reciprocal %93 {approx = true} : vector<2x8x1xf32> -> vector<2x8x1xf32>
    %95 = vector.broadcast %94 : vector<2x8x1xf32> to vector<2x8x8xf32>
    %96 = arith.mulf %91, %95 : vector<2x8x8xf32>
    %97 = arith.truncf %96 : vector<2x8x8xf32> to vector<2x8x8xbf16>
    "tpu.trace_start"() <{level = 10 : i32, message = "bnm,bmd->bnd"}> : () -> ()
    %cst_43 = arith.constant dense<0.000000e+00> : vector<2x8x8xf32>
    %98 = tpu.matmul %97, %85, %cst_43 {dimension_numbers = #tpu.dot_dimension_numbers<[2], [1], [1], [2], [0, 0, 0, 1, 1, 2], [0], [0]>} : vector<2x8x8xbf16>, vector<2x8x8xbf16>, vector<2x8x8xf32> -> vector<2x8x8xf32>
    "tpu.trace_stop"() : () -> ()
    %99 = vector.shape_cast %98 : vector<2x8x8xf32> to vector<16x8xf32>
    %100 = arith.truncf %99 : vector<16x8xf32> to vector<16x8xbf16>
    %c0_44 = arith.constant 0 : index
    %c16_45 = arith.constant 16 : index
    %101 = vector.load %arg20[%c0_44, %c16_45] : memref<16x32xbf16, #tpu.memory_space<vmem>>, vector<16x8xbf16>
    tpu.vector_store %arg20[%c0_44, %c16_45], %100 {strides = array<i32>} : memref<16x32xbf16, #tpu.memory_space<vmem>>, vector<16x8xbf16>,
    %c0_46 = arith.constant 0 : index
    %c24 = arith.constant 24 : index
    %102 = vector.load %arg19[%c0_46, %c24] : memref<16x96xbf16, #tpu.memory_space<vmem>>, vector<16x8xbf16>
    %103 = vector.shape_cast %102 : vector<16x8xbf16> to vector<2x8x8xbf16>
    %c0_47 = arith.constant 0 : index
    %c56 = arith.constant 56 : index
    %104 = vector.load %arg19[%c0_47, %c56] : memref<16x96xbf16, #tpu.memory_space<vmem>>, vector<16x8xbf16>
    %105 = vector.shape_cast %104 : vector<16x8xbf16> to vector<2x8x8xbf16>
    %c0_48 = arith.constant 0 : index
    %c88 = arith.constant 88 : index
    %106 = vector.load %arg19[%c0_48, %c88] : memref<16x96xbf16, #tpu.memory_space<vmem>>, vector<16x8xbf16>
    %107 = vector.shape_cast %106 : vector<16x8xbf16> to vector<2x8x8xbf16>
    "tpu.trace_start"() <{level = 10 : i32, message = "bnd,bmd->bnm"}> : () -> ()
    %cst_49 = arith.constant dense<0.000000e+00> : vector<2x8x8xf32>
    %108 = tpu.matmul %103, %105, %cst_49 {dimension_numbers = #tpu.dot_dimension_numbers<[2], [2], [1], [1], [0, 0, 0, 1, 1, 1], [0], [0]>} : vector<2x8x8xbf16>, vector<2x8x8xbf16>, vector<2x8x8xf32> -> vector<2x8x8xf32>
    "tpu.trace_stop"() : () -> ()
    %cst_50 = arith.constant dense<0xFF800000> : vector<2x8xf32>
    %109 = vector.multi_reduction <maximumf>, %108, %cst_50 [2] : vector<2x8x8xf32> to vector<2x8xf32>
    %110 = vector.shape_cast %109 : vector<2x8xf32> to vector<2x8x1xf32>
    %111 = vector.broadcast %110 : vector<2x8x1xf32> to vector<2x8x8xf32>
    %112 = arith.subf %108, %111 : vector<2x8x8xf32>
    %113 = math.exp %112 : vector<2x8x8xf32>
    %cst_51 = arith.constant dense<0.000000e+00> : vector<2x8xf32>
    %114 = vector.multi_reduction <add>, %113, %cst_51 [2] : vector<2x8x8xf32> to vector<2x8xf32>
    %115 = vector.shape_cast %114 : vector<2x8xf32> to vector<2x8x1xf32>
    %116 = tpu.reciprocal %115 {approx = true} : vector<2x8x1xf32> -> vector<2x8x1xf32>
    %117 = vector.broadcast %116 : vector<2x8x1xf32> to vector<2x8x8xf32>
    %118 = arith.mulf %113, %117 : vector<2x8x8xf32>
    %119 = arith.truncf %118 : vector<2x8x8xf32> to vector<2x8x8xbf16>
    "tpu.trace_start"() <{level = 10 : i32, message = "bnm,bmd->bnd"}> : () -> ()
    %cst_52 = arith.constant dense<0.000000e+00> : vector<2x8x8xf32>
    %120 = tpu.matmul %119, %107, %cst_52 {dimension_numbers = #tpu.dot_dimension_numbers<[2], [1], [1], [2], [0, 0, 0, 1, 1, 2], [0], [0]>} : vector<2x8x8xbf16>, vector<2x8x8xbf16>, vector<2x8x8xf32> -> vector<2x8x8xf32>
    "tpu.trace_stop"() : () -> ()
    %121 = vector.shape_cast %120 : vector<2x8x8xf32> to vector<16x8xf32>
    %122 = arith.truncf %121 : vector<16x8xf32> to vector<16x8xbf16>
    %c0_53 = arith.constant 0 : index
    %c24_54 = arith.constant 24 : index
    %123 = vector.load %arg20[%c0_53, %c24_54] : memref<16x32xbf16, #tpu.memory_space<vmem>>, vector<16x8xbf16>
    tpu.vector_store %arg20[%c0_53, %c24_54], %122 {strides = array<i32>} : memref<16x32xbf16, #tpu.memory_space<vmem>>, vector<16x8xbf16>,
    %c0_55 = arith.constant 0 : index
    %c0_56 = arith.constant 0 : index
    %124 = vector.load %arg20[%c0_55, %c0_56] : memref<16x32xbf16, #tpu.memory_space<vmem>>, vector<16x32xbf16>
    %c0_57 = arith.constant 0 : index
    %c0_58 = arith.constant 0 : index
    %c0_59 = arith.constant 0 : index
    %125 = vector.load %arg6[%c0_57, %c0_58, %c0_59] : memref<1x32x32xbf16, #tpu.memory_space<vmem>>, vector<1x32x32xbf16>
    %126 = vector.shape_cast %125 : vector<1x32x32xbf16> to vector<32x32xbf16>
    %cst_60 = arith.constant dense<0.000000e+00> : vector<16x32xf32>
    %127 = tpu.matmul %124, %126, %cst_60 {dimension_numbers = #tpu.dot_dimension_numbers<[1], [0], [0], [1], [0, 0, 1, 1], [], []>} : vector<16x32xbf16>, vector<32x32xbf16>, vector<16x32xf32> -> vector<16x32xf32>
    %128 = arith.addf %3, %127 : vector<16x32xf32>
    %c0_61 = arith.constant 0 : index
    %c0_62 = arith.constant 0 : index
    %c0_63 = arith.constant 0 : index
    %129 = vector.load %arg7[%c0_61, %c0_62, %c0_63] : memref<1x1x32xf32, #tpu.memory_space<vmem>>, vector<1x1x32xf32>
    %130 = vector.shape_cast %129 : vector<1x1x32xf32> to vector<1x32xf32>
    %c0_64 = arith.constant 0 : index
    %c0_65 = arith.constant 0 : index
    %c0_66 = arith.constant 0 : index
    %131 = vector.load %arg8[%c0_64, %c0_65, %c0_66] : memref<1x1x32xf32, #tpu.memory_space<vmem>>, vector<1x1x32xf32>
    %132 = vector.shape_cast %131 : vector<1x1x32xf32> to vector<1x32xf32>
    %cst_67 = arith.constant dense<0.000000e+00> : vector<16xf32>
    %133 = vector.multi_reduction <add>, %128, %cst_67 [1] : vector<16x32xf32> to vector<16xf32>
    %134 = vector.shape_cast %133 : vector<16xf32> to vector<16x1xf32>
    %cst_68 = arith.constant 3.200000e+01 : f32
    %135 = vector.broadcast %cst_68 : f32 to vector<16x1xf32>
    %136 = arith.divf %134, %135 : vector<16x1xf32>
    %137 = vector.broadcast %136 : vector<16x1xf32> to vector<16x32xf32>
    %138 = arith.subf %128, %137 : vector<16x32xf32>
    %139 = arith.mulf %138, %138 : vector<16x32xf32>
    %cst_69 = arith.constant dense<0.000000e+00> : vector<16xf32>
    %140 = vector.multi_reduction <add>, %139, %cst_69 [1] : vector<16x32xf32> to vector<16xf32>
    %141 = vector.shape_cast %140 : vector<16xf32> to vector<16x1xf32>
    %cst_70 = arith.constant 3.200000e+01 : f32
    %142 = vector.broadcast %cst_70 : f32 to vector<16x1xf32>
    %143 = arith.divf %141, %142 : vector<16x1xf32>
    %144 = vector.broadcast %136 : vector<16x1xf32> to vector<16x32xf32>
    %145 = arith.subf %128, %144 : vector<16x32xf32>
    %cst_71 = arith.constant 9.99999974E-6 : f32
    %146 = vector.broadcast %cst_71 : f32 to vector<16x1xf32>
    %147 = arith.addf %143, %146 : vector<16x1xf32>
    %148 = math.rsqrt %147 : vector<16x1xf32>
    %149 = vector.broadcast %148 : vector<16x1xf32> to vector<16x32xf32>
    %150 = arith.mulf %145, %149 : vector<16x32xf32>
    %151 = vector.broadcast %130 : vector<1x32xf32> to vector<16x32xf32>
    %152 = arith.mulf %150, %151 : vector<16x32xf32>
    %153 = vector.broadcast %132 : vector<1x32xf32> to vector<16x32xf32>
    %154 = arith.addf %152, %153 : vector<16x32xf32>
    %155 = arith.truncf %154 : vector<16x32xf32> to vector<16x32xbf16>
    %c0_72 = arith.constant 0 : index
    %c0_73 = arith.constant 0 : index
    %c0_74 = arith.constant 0 : index
    %156 = vector.load %arg9[%c0_72, %c0_73, %c0_74] : memref<1x32x64xbf16, #tpu.memory_space<vmem>>, vector<1x32x64xbf16>
    %157 = vector.shape_cast %156 : vector<1x32x64xbf16> to vector<32x64xbf16>
    %cst_75 = arith.constant dense<0.000000e+00> : vector<16x64xf32>
    %158 = tpu.matmul %155, %157, %cst_75 {dimension_numbers = #tpu.dot_dimension_numbers<[1], [0], [0], [1], [0, 0, 1, 1], [], []>} : vector<16x32xbf16>, vector<32x64xbf16>, vector<16x64xf32> -> vector<16x64xf32>
    %c0_76 = arith.constant 0 : index
    %c0_77 = arith.constant 0 : index
    %c0_78 = arith.constant 0 : index
    %159 = vector.load %arg10[%c0_76, %c0_77, %c0_78] : memref<1x1x64xf32, #tpu.memory_space<vmem>>, vector<1x1x64xf32>
    %160 = vector.shape_cast %159 : vector<1x1x64xf32> to vector<1x64xf32>
    %161 = vector.broadcast %160 : vector<1x64xf32> to vector<16x64xf32>
    %162 = arith.addf %158, %161 : vector<16x64xf32>
    %163 = arith.mulf %162, %162 : vector<16x64xf32>
    %164 = arith.mulf %162, %163 : vector<16x64xf32>
    %cst_79 = arith.constant 4.471500e-02 : f32
    %165 = vector.broadcast %cst_79 : f32 to vector<16x64xf32>
    %166 = arith.mulf %165, %164 : vector<16x64xf32>
    %167 = arith.addf %162, %166 : vector<16x64xf32>
    %cst_80 = arith.constant 0.797884583 : f32
    %168 = vector.broadcast %cst_80 : f32 to vector<16x64xf32>
    %169 = arith.mulf %168, %167 : vector<16x64xf32>
    %170 = math.tanh %169 : vector<16x64xf32>
    %cst_81 = arith.constant 1.000000e+00 : f32
    %171 = vector.broadcast %cst_81 : f32 to vector<16x64xf32>
    %172 = arith.addf %171, %170 : vector<16x64xf32>
    %cst_82 = arith.constant 5.000000e-01 : f32
    %173 = vector.broadcast %cst_82 : f32 to vector<16x64xf32>
    %174 = arith.mulf %173, %172 : vector<16x64xf32>
    %175 = arith.mulf %162, %174 : vector<16x64xf32>
    %176 = arith.truncf %175 : vector<16x64xf32> to vector<16x64xbf16>
    %c0_83 = arith.constant 0 : index
    %c0_84 = arith.constant 0 : index
    %c0_85 = arith.constant 0 : index
    %177 = vector.load %arg11[%c0_83, %c0_84, %c0_85] : memref<1x64x32xbf16, #tpu.memory_space<vmem>>, vector<1x64x32xbf16>
    %178 = vector.shape_cast %177 : vector<1x64x32xbf16> to vector<64x32xbf16>
    %cst_86 = arith.constant dense<0.000000e+00> : vector<16x32xf32>
    %179 = tpu.matmul %176, %178, %cst_86 {dimension_numbers = #tpu.dot_dimension_numbers<[1], [0], [0], [1], [0, 0, 1, 1], [], []>} : vector<16x64xbf16>, vector<64x32xbf16>, vector<16x32xf32> -> vector<16x32xf32>
    %c0_87 = arith.constant 0 : index
    %c0_88 = arith.constant 0 : index
    %c0_89 = arith.constant 0 : index
    %180 = vector.load %arg12[%c0_87, %c0_88, %c0_89] : memref<1x1x32xf32, #tpu.memory_space<vmem>>, vector<1x1x32xf32>
    %181 = vector.shape_cast %180 : vector<1x1x32xf32> to vector<1x32xf32>
    %182 = vector.broadcast %181 : vector<1x32xf32> to vector<16x32xf32>
    %183 = arith.addf %179, %182 : vector<16x32xf32>
    %184 = arith.addf %128, %183 : vector<16x32xf32>
    %c0_90 = arith.constant 0 : index
    %c0_91 = arith.constant 0 : index
    %185 = vector.load %arg18[%c0_90, %c0_91] : memref<16x32xf32, #tpu.memory_space<vmem>>, vector<16x32xf32>
    tpu.vector_store %arg18[%c0_90, %c0_91], %184 {strides = array<i32>} : memref<16x32xf32, #tpu.memory_space<vmem>>, vector<16x32xf32>,
    %c1_i32 = arith.constant 1 : i32
    %186 = arith.cmpi eq, %arg1, %c1_i32 : i32
    %187 = arith.extui %186 : i1 to i32
    %c0_i32_92 = arith.constant 0 : i32
    %188 = arith.cmpi ne, %187, %c0_i32_92 : i32
    scf.if %188 {
      %c0_93 = arith.constant 0 : index
      %c0_94 = arith.constant 0 : index
      %189 = vector.load %arg13[%c0_93, %c0_94] : memref<1x32xf32, #tpu.memory_space<vmem>>, vector<1x32xf32>
      %c0_95 = arith.constant 0 : index
      %c0_96 = arith.constant 0 : index
      %190 = vector.load %arg14[%c0_95, %c0_96] : memref<1x32xf32, #tpu.memory_space<vmem>>, vector<1x32xf32>
      %cst_97 = arith.constant dense<0.000000e+00> : vector<16xf32>
      %191 = vector.multi_reduction <add>, %184, %cst_97 [1] : vector<16x32xf32> to vector<16xf32>
      %192 = vector.shape_cast %191 : vector<16xf32> to vector<16x1xf32>
      %cst_98 = arith.constant 3.200000e+01 : f32
      %193 = vector.broadcast %cst_98 : f32 to vector<16x1xf32>
      %194 = arith.divf %192, %193 : vector<16x1xf32>
      %195 = vector.broadcast %194 : vector<16x1xf32> to vector<16x32xf32>
      %196 = arith.subf %184, %195 : vector<16x32xf32>
      %197 = arith.mulf %196, %196 : vector<16x32xf32>
      %cst_99 = arith.constant dense<0.000000e+00> : vector<16xf32>
      %198 = vector.multi_reduction <add>, %197, %cst_99 [1] : vector<16x32xf32> to vector<16xf32>
      %199 = vector.shape_cast %198 : vector<16xf32> to vector<16x1xf32>
      %cst_100 = arith.constant 3.200000e+01 : f32
      %200 = vector.broadcast %cst_100 : f32 to vector<16x1xf32>
      %201 = arith.divf %199, %200 : vector<16x1xf32>
      %202 = vector.broadcast %194 : vector<16x1xf32> to vector<16x32xf32>
      %203 = arith.subf %184, %202 : vector<16x32xf32>
      %cst_101 = arith.constant 9.99999974E-6 : f32
      %204 = vector.broadcast %cst_101 : f32 to vector<16x1xf32>
      %205 = arith.addf %201, %204 : vector<16x1xf32>
      %206 = math.rsqrt %205 : vector<16x1xf32>
      %207 = vector.broadcast %206 : vector<16x1xf32> to vector<16x32xf32>
      %208 = arith.mulf %203, %207 : vector<16x32xf32>
      %209 = vector.broadcast %189 : vector<1x32xf32> to vector<16x32xf32>
      %210 = arith.mulf %208, %209 : vector<16x32xf32>
      %211 = vector.broadcast %190 : vector<1x32xf32> to vector<16x32xf32>
      %212 = arith.addf %210, %211 : vector<16x32xf32>
      %213 = vector.shape_cast %212 : vector<16x32xf32> to vector<2x8x32xf32>
      %cst_102 = arith.constant dense<0.000000e+00> : vector<2x32xf32>
      %214 = vector.multi_reduction <add>, %213, %cst_102 [1] : vector<2x8x32xf32> to vector<2x32xf32>
      %cst_103 = arith.constant 8.000000e+00 : f32
      %215 = vector.broadcast %cst_103 : f32 to vector<2x32xf32>
      %216 = arith.divf %214, %215 : vector<2x32xf32>
      %217 = arith.truncf %216 : vector<2x32xf32> to vector<2x32xbf16>
      %c0_104 = arith.constant 0 : index
      %c0_105 = arith.constant 0 : index
      %218 = vector.load %arg15[%c0_104, %c0_105] : memref<32x128xbf16, #tpu.memory_space<vmem>>, vector<32x128xbf16>
      %cst_106 = arith.constant dense<0.000000e+00> : vector<2x128xf32>
      %219 = tpu.matmul %217, %218, %cst_106 {dimension_numbers = #tpu.dot_dimension_numbers<[1], [0], [0], [1], [0, 0, 1, 1], [], []>} : vector<2x32xbf16>, vector<32x128xbf16>, vector<2x128xf32> -> vector<2x128xf32>
      %c0_107 = arith.constant 0 : index
      %c0_108 = arith.constant 0 : index
      %220 = vector.load %arg16[%c0_107, %c0_108] : memref<1x128xf32, #tpu.memory_space<vmem>>, vector<1x128xf32>
      %221 = vector.broadcast %220 : vector<1x128xf32> to vector<2x128xf32>
      %222 = arith.addf %219, %221 : vector<2x128xf32>
      %c0_109 = arith.constant 0 : index
      %c0_110 = arith.constant 0 : index
      %223 = vector.load %arg17[%c0_109, %c0_110] : memref<2x128xf32, #tpu.memory_space<vmem>>, vector<2x128xf32>
      tpu.vector_store %arg17[%c0_109, %c0_110], %222 {strides = array<i32>} : memref<2x128xf32, #tpu.memory_space<vmem>>, vector<2x128xf32>,
    } else {
    }
    return
  }
  func.func @transform_0(%arg0: i32, %arg1: i32) -> (i32, i32, i32) {
    %c0_i32 = arith.constant 0 : i32
    %c0_i32_0 = arith.constant 0 : i32
    %c0_i32_1 = arith.constant 0 : i32
    return %arg0, %c0_i32, %c0_i32_0 : i32, i32, i32
  }
  func.func @transform_1(%arg0: i32, %arg1: i32) -> (i32, i32, i32) {
    %c0_i32 = arith.constant 0 : i32
    %c0_i32_0 = arith.constant 0 : i32
    %c0_i32_1 = arith.constant 0 : i32
    return %arg1, %c0_i32, %c0_i32_0 : i32, i32, i32
  }
  func.func @transform_2(%arg0: i32, %arg1: i32) -> (i32, i32, i32) {
    %c0_i32 = arith.constant 0 : i32
    %c0_i32_0 = arith.constant 0 : i32
    %c0_i32_1 = arith.constant 0 : i32
    return %arg1, %c0_i32, %c0_i32_0 : i32, i32, i32
  }
  func.func @transform_3(%arg0: i32, %arg1: i32) -> (i32, i32, i32) {
    %c0_i32 = arith.constant 0 : i32
    %c0_i32_0 = arith.constant 0 : i32
    %c0_i32_1 = arith.constant 0 : i32
    return %arg1, %c0_i32, %c0_i32_0 : i32, i32, i32
  }
  func.func @transform_4(%arg0: i32, %arg1: i32) -> (i32, i32, i32) {
    %c0_i32 = arith.constant 0 : i32
    %c0_i32_0 = arith.constant 0 : i32
    %c0_i32_1 = arith.constant 0 : i32
    return %arg1, %c0_i32, %c0_i32_0 : i32, i32, i32
  }
  func.func @transform_5(%arg0: i32, %arg1: i32) -> (i32, i32, i32) {
    %c0_i32 = arith.constant 0 : i32
    %c0_i32_0 = arith.constant 0 : i32
    %c0_i32_1 = arith.constant 0 : i32
    return %arg1, %c0_i32, %c0_i32_0 : i32, i32, i32
  }
  func.func @transform_6(%arg0: i32, %arg1: i32) -> (i32, i32, i32) {
    %c0_i32 = arith.constant 0 : i32
    %c0_i32_0 = arith.constant 0 : i32
    %c0_i32_1 = arith.constant 0 : i32
    return %arg1, %c0_i32, %c0_i32_0 : i32, i32, i32
  }
  func.func @transform_7(%arg0: i32, %arg1: i32) -> (i32, i32, i32) {
    %c0_i32 = arith.constant 0 : i32
    %c0_i32_0 = arith.constant 0 : i32
    %c0_i32_1 = arith.constant 0 : i32
    return %arg1, %c0_i32, %c0_i32_0 : i32, i32, i32
  }
  func.func @transform_8(%arg0: i32, %arg1: i32) -> (i32, i32, i32) {
    %c0_i32 = arith.constant 0 : i32
    %c0_i32_0 = arith.constant 0 : i32
    %c0_i32_1 = arith.constant 0 : i32
    return %arg1, %c0_i32, %c0_i32_0 : i32, i32, i32
  }
  func.func @transform_9(%arg0: i32, %arg1: i32) -> (i32, i32, i32) {
    %c0_i32 = arith.constant 0 : i32
    %c0_i32_0 = arith.constant 0 : i32
    %c0_i32_1 = arith.constant 0 : i32
    return %arg1, %c0_i32, %c0_i32_0 : i32, i32, i32
  }
  func.func @transform_10(%arg0: i32, %arg1: i32) -> (i32, i32, i32) {
    %c0_i32 = arith.constant 0 : i32
    %c0_i32_0 = arith.constant 0 : i32
    %c0_i32_1 = arith.constant 0 : i32
    return %arg1, %c0_i32, %c0_i32_0 : i32, i32, i32
  }
  func.func @transform_11(%arg0: i32, %arg1: i32) -> (i32, i32) {
    %c0_i32 = arith.constant 0 : i32
    %c0_i32_0 = arith.constant 0 : i32
    %c0_i32_1 = arith.constant 0 : i32
    return %c0_i32, %c0_i32_0 : i32, i32
  }
  func.func @transform_12(%arg0: i32, %arg1: i32) -> (i32, i32) {
    %c0_i32 = arith.constant 0 : i32
    %c0_i32_0 = arith.constant 0 : i32
    %c0_i32_1 = arith.constant 0 : i32
    return %c0_i32, %c0_i32_0 : i32, i32
  }
  func.func @transform_13(%arg0: i32, %arg1: i32) -> (i32, i32) {
    %c0_i32 = arith.constant 0 : i32
    %c0_i32_0 = arith.constant 0 : i32
    %c0_i32_1 = arith.constant 0 : i32
    return %c0_i32, %c0_i32_0 : i32, i32
  }
  func.func @transform_14(%arg0: i32, %arg1: i32) -> (i32, i32) {
    %c0_i32 = arith.constant 0 : i32
    %c0_i32_0 = arith.constant 0 : i32
    %c0_i32_1 = arith.constant 0 : i32
    return %c0_i32, %c0_i32_0 : i32, i32
  }
  func.func @transform_15(%arg0: i32, %arg1: i32) -> (i32, i32) {
    %c0_i32 = arith.constant 0 : i32
    %c0_i32_0 = arith.constant 0 : i32
    return %arg0, %c0_i32 : i32, i32
  }
}

</mosaic_0001>

<bundles_post_ra>
// kernel: tpu_custom_call.1
= control target key start
LH: loop header
LB: loop body
LE: loop exit
PB: predicated region body
PF: predicated region fallthrough
CT: control target
= control target key end

     0   :  { %s4036_s0 = inlined_call_operand.hbm [shape: bf16[2,8,32], index: 0, kind: input, shape index: {}]   ;;  %s4037_s1 = inlined_call_operand.hbm [shape: f32[2,1,32], index: 1, kind: input, shape index: {}]   ;;  %s4038_s2 = inlined_call_operand.hbm [shape: f32[2,1,32], index: 2, kind: input, shape index: {}]   ;;  %s4039_s3 = inlined_call_operand.vmem [shape: bf16[2,32,96], index: 3, kind: input, shape index: {}]   ;;  %s4040_s4 = inlined_call_operand.vmem [shape: bf16[2,32,32], index: 4, kind: input, shape index: {}]   ;;  %s4041_s5 = inlined_call_operand.hbm [shape: f32[2,1,32], index: 5, kind: input, shape index: {}]   ;;  %s4042_s6 = inlined_call_operand.hbm [shape: f32[2,1,32], index: 6, kind: input, shape index: {}]   ;;  %s4043_s7 = inlined_call_operand.vmem [shape: bf16[2,32,64], index: 7, kind: input, shape index: {}]   ;;  %s4044_s8 = inlined_call_operand.hbm [shape: f32[2,1,64], index: 8, kind: input, shape index: {}]   ;;  %s4045_s9 = inlined_call_operand.vmem [shape: bf16[2,64,32], index: 9, kind: input, shape index: {}]   ;;  %s4046_s10 = inlined_call_operand.hbm [shape: f32[2,1,32], index: 10, kind: input, shape index: {}]   ;;  %s4047_s11 = inlined_call_operand.vmem [shape: f32[1,32], index: 11, kind: input, shape index: {}]   ;;  %s4048_s12 = inlined_call_operand.hbm [shape: f32[1,32], index: 12, kind: input, shape index: {}]   ;;  %s4049_s13 = inlined_call_operand.vmem [shape: bf16[32,128], index: 13, kind: input, shape index: {}]   ;;  %s4050_s14 = inlined_call_operand.vmem [shape: f32[1,128], index: 14, kind: input, shape index: {}]   ;;  %s4051_s15 = inlined_call_operand.hbm [shape: f32[2,128], index: 15, kind: output, shape index: {}]  }
   0x1   :  { %4063 = sst [smem:[#allocation31_spill]] %s4037_s1 }
   0x2   :  { %4064 = sst [smem:[#allocation32_spill]] %s4039_s3 }
   0x3   :  { %4065 = sst [smem:[#allocation33_spill]] %s4040_s4 }
   0x4   :  { %4066 = sst [smem:[#allocation34_spill]] %s4041_s5 }
   0x5   :  { %4067 = sst [smem:[#allocation35_spill]] %s4043_s7 }
   0x6   :  { %4068 = sst [smem:[#allocation36_spill]] %s4044_s8 }
   0x7   :  { %4069 = sst [smem:[#allocation37_spill]] %s4045_s9 }
   0x8   :  { %4070 = sst [smem:[#allocation38_spill]] %s4047_s11 }
   0x9   :  { %4071 = sst [smem:[#allocation39_spill]] %s4049_s13 }
   0xa   :  { %4072 = sst [smem:[#allocation40_spill]] %s4050_s14 }
   0xb   :  { %4073 = sst [smem:[#allocation41_spill]] %s4051_s15 }
   0xc   :  { %20 = vsyncpa [#allocation6], 0 }
   0xd   :  { %21 = vsyncpa [#allocation9], 0 }
   0xe   :  { %23 = vsyncpa [#allocation9 + $0x1], 0 }
   0xf   :  { %24 = vsyncpa [#allocation12], 0 }
  0x10   :  { %26 = vsyncpa [#allocation12 + $0x1], 0 }
  0x11   :  { %27 = vsyncpa [#allocation15], 0 }
  0x12   :  { %29 = vsyncpa [#allocation15 + $0x1], 0 }
  0x13   :  { %30 = vsyncpa [#allocation18], 0 }
  0x14   :  { %31 = vsyncpa [#allocation7], 0  ;;  %s3400_s18 = smov 0   ;;  %s3402_s19 = smov 0  }
  0x15   :  { %s3404_s20 = smov 0   ;;  %s3406_s21 = smov 0  }
  0x16   :  { %s3408_s22 = smov 0   ;;  %s3410_s23 = smov 0  }
  0x17 LB: > { %4074 = sst [smem:[#allocation26_spill]] %s3277_s20  ;;  %s46_s24 = sadd.s32 1, %s3285_s22  ;;  %s3289_s23 = sphi %s3410_s23, %s37_s23   ;;  %s3285_s22 = sphi %s3408_s22, %s4119_s22   ;;  %s3281_s21 = sphi %s3406_s21, %s4118_s21   ;;  %s3277_s20 = sphi %s3404_s20, %s4117_s20   ;;  %s3273_s19 = sphi %s3402_s19, %s4121_s19   ;;  %s3269_s18 = sphi %s3400_s18, %s4120_s18  }
  0x18   : > { %4075 = sst [smem:[#allocation27_spill]] %s3285_s22  ;;  %s82_s25 = sadd.s32 1, %s3277_s20 }
  0x19   : > { %4076 = sst [smem:[#allocation28_spill]] %s3289_s23  ;;  %p47_p0 = scmp.ge.s32.totalorder %s46_s24, 2 }
  0x1a   : > { %p89_p1 = scmp.ne.s32.totalorder %s3277_s20, %s3273_s19  ;;  %p90_p2 = scmp.eq.s32.totalorder %s3289_s23, 0 }
  0x1b   : > { %s4123_s24 = smov (%p47_p0, %s46_s24), 0  ;;  %p2819_p4 = scmp.lt.s32.totalorder %s3289_s23, 2 }
  0x1c   : > { %4077 = sst [smem:[#allocation29_spill]] %s4123_s24  ;;  %p91_p3 = por %p90_p2, %p89_p1 }
  0x1d   : > { %s79_s26 = ssub.s32 %s3285_s22, %s4123_s24  ;;  %s3441_s27 = sand.u32 1, %s3289_s23  }
  0x1e   : > { %p80_p5 = scmp.eq.s32.totalorder %s79_s26, 0  ;;  %s3444_s28 = sand.u32 1, %s3277_s20  }
  0x1f   : > { %s3447_s29 = sshll.u32 %s3285_s22, 4  ;;  %s4079_s1 = sld [smem:[#allocation31_spill]] }
  0x20   : > { %s3450_s30 = scalar_select %p80_p5, %s3277_s20, %s82_s25  }
  0x21   : > { %s502_s24 = scalar_lea.vmem [#allocation8], %s3444_s28  ;;  %p3459_p6 = pnand %p2819_p4, %p91_p3 }
  0x22   : > { %4078 = sst [smem:[#allocation30_spill]] %s3450_s30  ;;  %s509_s14 = sshll.u32 %s502_s24, 4  ;;  %s3463_s14 = int_to_ptr.vmem [resolvable:$true] %s509_s14 }
  0x23   : > { %s4080_s26 = scalar_select %p3459_p6, 1, 0 }
  0x24   : > { %p3470_p8 = pneg %p3459_p6 }
  0x25   : > { %s3456_s15 = scalar_lea.hbm %s4079_s1, %s3447_s29  ;;  %s2962_s30 = scalar_lea.hbm %s4079_s1, 32 }
  0x26   : > { %s2957_s22 = scalar_lea.hbm %s3456_s15, 16  ;;  %p2963_p11 = scmp.lt.u32.totalorder %s3456_s15, %s4079_s1 }
  0x27   : > { %p2958_p7 = scmp.ne.s32.totalorder %s3456_s15, %s2957_s22  ;;  %p2964_p12 = scmp.lt.u32.totalorder %s2962_s30, %s2957_s22 }
  0x28   : > { %p2966_p0 = scmp.lt.u32.totalorder %s2957_s22, %s3456_s15 }
  0x29   : > { %p2960_p9 = pnand %p3470_p8, %p2958_p7  ;;  %p2965_p13 = por %p2964_p12, %p2963_p11 }
  0x2b   : > { %p2961_p10 = pneg %p2960_p9  ;;  %p2967_p1 = por %p2966_p0, %p2965_p13 }
  0x2d   : > { %p2968_p2 = pnand %p2967_p1, %p2961_p10 }
  0x2f   : > { %2971 = shalt.err (!%p2968_p2)
}
  0x30   : > { %s2972_s25 = scalar_lea.vmem %s3463_s14, 16  ;;  %s3291_s24 = smov [#allocation8]  }
  0x31   : > { %p2973_p3 = scmp.ne.s32.totalorder %s3463_s14, %s2972_s25  ;;  %s2977_s17 = sshll.u32 %s3291_s24, 4  ;;  %s2978_s17 = int_to_ptr.vmem [resolvable:$false] %s2977_s17 }
  0x32   : > { %s2979_s11 = scalar_lea.vmem %s2978_s17, 32  ;;  %p2980_p7 = scmp.lt.s32.totalorder %s3463_s14, %s2978_s17 }
  0x33   : > { %p2975_p4 = pnand %p2973_p3, %p3470_p8  ;;  %p2981_p9 = scmp.lt.s32.totalorder %s2979_s11, %s2972_s25 }
  0x35   : > { %p2976_p5 = pneg %p2975_p4  ;;  %p2982_p11 = por %p2981_p9, %p2980_p7 }
  0x37   : > { %p2983_p12 = pnand %p2982_p11, %p2976_p5 }
  0x39   : > { %2986 = shalt.err (!%p2983_p12)
}
  0x3a   : > { %s4082_s20 = scalar_lea.sflag [#allocation9], %s3441_s27  ;;  %s4083_s5 = sld [smem:[#allocation34_spill]] }
  0x3b   : > { %2801 = dma.hbm_to_vmem [thread:$0]  (!%p3459_p6), %s3456_s15, 16, %s3463_s14, %s4082_s20  }
  0x3c   : > { %s552_s25 = scalar_lea.vmem [#allocation11], %s3444_s28 }
  0x3d   : > { %s559_s17 = sshll.u32 %s552_s25, 4  ;;  %s560_s17 = int_to_ptr.vmem [resolvable:$true] %s559_s17 }
  0x40   : > { %s3499_s24 = scalar_lea.hbm %s4083_s5, %s3447_s29  ;;  %s2992_s15 = scalar_lea.hbm %s4083_s5, 32 }
  0x41   : > { %s2987_s1 = scalar_lea.hbm %s3499_s24, 16  ;;  %p2993_p1 = scmp.lt.u32.totalorder %s3499_s24, %s4083_s5 }
  0x42   : > { %p2988_p10 = scmp.ne.s32.totalorder %s3499_s24, %s2987_s1  ;;  %p2994_p2 = scmp.lt.u32.totalorder %s2992_s15, %s2987_s1 }
  0x43   : > { %p2996_p4 = scmp.lt.u32.totalorder %s2987_s1, %s3499_s24 }
  0x44   : > { %p2990_p13 = pnand %p2988_p10, %p3470_p8  ;;  %p2995_p3 = por %p2994_p2, %p2993_p1 }
  0x46   : > { %p2991_p0 = pneg %p2990_p13  ;;  %p2997_p5 = por %p2996_p4, %p2995_p3 }
  0x48   : > { %p2998_p7 = pnand %p2997_p5, %p2991_p0 }
  0x4a   : > { %3001 = shalt.err (!%p2998_p7)
}
  0x4b   : > { %s3002_s30 = scalar_lea.vmem %s560_s17, 16  ;;  %s3292_s25 = smov [#allocation11]  }
  0x4c   : > { %p3003_p9 = scmp.ne.s32.totalorder %s560_s17, %s3002_s30  ;;  %s3007_s11 = sshll.u32 %s3292_s25, 4  ;;  %s3008_s11 = int_to_ptr.vmem [resolvable:$false] %s3007_s11 }
  0x4d   : > { %s3009_s13 = scalar_lea.vmem %s3008_s11, 32  ;;  %p3010_p10 = scmp.lt.s32.totalorder %s560_s17, %s3008_s11 }
  0x4e   : > { %p3005_p11 = pnand %p3003_p9, %p3470_p8  ;;  %p3011_p13 = scmp.lt.s32.totalorder %s3009_s13, %s3002_s30 }
  0x50   : > { %p3006_p12 = pneg %p3005_p11  ;;  %p3012_p6 = por %p3011_p13, %p3010_p10 }
  0x52   : > { %p3013_p1 = pnand %p3012_p6, %p3006_p12 }
  0x54   : > { %3016 = shalt.err (!%p3013_p1)
}
  0x55   : > { %p4084_p2 = scmp.ne.s32.totalorder %s4080_s26, 0  ;;  %s4085_s1 = scalar_lea.sflag [#allocation12], %s3441_s27 }
  0x56   : > { %s4086_s8 = sld [smem:[#allocation36_spill]]  ;;  %s594_s11 = scalar_lea.vmem [#allocation14], %s3444_s28 }
  0x57   : > { %2807 = dma.hbm_to_vmem [thread:$0]  (!%p4084_p2), %s3499_s24, 16, %s560_s17, %s4085_s1  }
  0x58   : > { %s601_s22 = sshll.u32 %s594_s11, 4  ;;  %s602_s22 = int_to_ptr.vmem [resolvable:$true] %s601_s22 }
  0x5c   : > { %s3526_s20 = scalar_lea.hbm %s4086_s8, %s3447_s29  ;;  %s3022_s17 = scalar_lea.hbm %s4086_s8, 32 }
  0x5d   : > { %s3017_s25 = scalar_lea.hbm %s3526_s20, 16  ;;  %p3023_p4 = scmp.lt.u32.totalorder %s3526_s20, %s4086_s8 }
  0x5e   : > { %p3018_p6 = scmp.ne.s32.totalorder %s3526_s20, %s3017_s25  ;;  %p3024_p5 = scmp.lt.u32.totalorder %s3022_s17, %s3017_s25 }
  0x5f   : > { %p3026_p9 = scmp.lt.u32.totalorder %s3017_s25, %s3526_s20 }
  0x60   : > { %p3020_p0 = pnand %p3018_p6, %p3470_p8  ;;  %p3025_p7 = por %p3024_p5, %p3023_p4 }
  0x62   : > { %p3021_p3 = pneg %p3020_p0  ;;  %p3027_p11 = por %p3026_p9, %p3025_p7 }
  0x64   : > { %p3028_p12 = pnand %p3027_p11, %p3021_p3 }
  0x66   : > { %3031 = shalt.err (!%p3028_p12)
}
  0x67   : > { %s3032_s15 = scalar_lea.vmem %s602_s22, 16  ;;  %s3293_s11 = smov [#allocation14]  }
  0x68   : > { %p3033_p10 = scmp.ne.s32.totalorder %s602_s22, %s3032_s15  ;;  %s3037_s30 = sshll.u32 %s3293_s11, 4  ;;  %s3038_s30 = int_to_ptr.vmem [resolvable:$false] %s3037_s30 }
  0x69   : > { %s3039_s13 = scalar_lea.vmem %s3038_s30, 32  ;;  %p3040_p6 = scmp.lt.s32.totalorder %s602_s22, %s3038_s30 }
  0x6a   : > { %p3035_p13 = pnand %p3033_p10, %p3470_p8  ;;  %p3041_p0 = scmp.lt.s32.totalorder %s3039_s13, %s3032_s15 }
  0x6c   : > { %p3036_p1 = pneg %p3035_p13  ;;  %p3042_p2 = por %p3041_p0, %p3040_p6 }
  0x6e   : > { %p3043_p4 = pnand %p3042_p2, %p3036_p1 }
  0x70   : > { %3046 = shalt.err (!%p3043_p4)
}
  0x71   : > { %p4087_p5 = scmp.ne.s32.totalorder %s4080_s26, 0  ;;  %s4088_s25 = scalar_lea.sflag [#allocation15], %s3441_s27 }
  0x72   : > { %s3550_s24 = sadd.s32 4294967295, %s3289_s23   ;;  %p95_p2 = scmp.ne.s32.totalorder %s3273_s19, %s3269_s18 }
  0x73   : > { %2813 = dma.hbm_to_vmem [thread:$0]  (!%p4087_p5), %s3526_s20, 16, %s602_s22, %s4088_s25  }
  0x74   : > { %p4060_p3 = scmp.eq.s32.totalorder %s3550_s24, 0  ;;  %p2493_p7 = scmp.ge.s32.totalorder %s3289_s23, 1 }
  0x75   : > { %p450_p9 = scmp.lt.s32.totalorder %s3289_s23, 3  ;;  %s3294_s20 = smov [#allocation5]  }
  0x76   : > { %p3559_p11 = por %p4060_p3, %p95_p2  ;;  %s465_s22 = sshll.u32 %s3294_s20, 4  ;;  %s3567_s22 = int_to_ptr.vmem [resolvable:$true] %s465_s22 }
  0x77   : > { %p3563_p12 = pnand %p2493_p7, %p450_p9  ;;  %s3295_s1 = smov [#allocation17]  }
  0x78   : > { %s4089_s30 = scalar_select %p3559_p11, 1, 0 }
  0x79   : > { %s4090_s17 = scalar_select %p3563_p12, 1, 0 }
  0x7a   : > { %p2791_p10 = pneg %p3563_p12  ;;  %s482_s14 = sshll.u32 %s3295_s1, 4  ;;  %s3577_s14 = int_to_ptr.vmem [resolvable:$true] %s482_s14 }
  0x7b   : > { %s3583_s13 = scalar_lea.hbm %s4038_s2, %s3447_s29  ;;  %s519_s25 = scalar_lea.vmem [#allocation10], %s3444_s28 }
  0x7c   : > { %p3573_p13 = pnand %p2791_p10, %p4060_p3  ;;  %s3586_s20 = sshll.u32 %s519_s25, 4  ;;  %s527_s20 = int_to_ptr.vmem [resolvable:$true] %s3586_s20 }
  0x7d   : > { %s3047_s23 = scalar_lea.hbm %s4036_s0, 128 }
  0x7e   : > { %p3048_p1 = scmp.ne.s32.totalorder %s4036_s0, %s3047_s23  ;;  %p3049_p6 = pneg %p3573_p13 }
  0x7f   : > { %p3054_p2 = scmp.lt.u32.totalorder %s3047_s23, %s4036_s0 }
  0x80   : > { %p3050_p0 = pnand %p3049_p6, %p3048_p1 }
  0x82   : > { %p3051_p4 = pneg %p3050_p0 }
  0x84   : > { %p3056_p7 = pnand %p3054_p2, %p3051_p4 }
  0x86   : > { %3059 = shalt.err (!%p3056_p7)
}
  0x87   : > { %s3060_s5 = scalar_lea.vmem %s3567_s22, 128  ;;  %p3068_p11 = scmp.lt.s32.totalorder %s3567_s22, %s3567_s22 }
  0x88   : > { %p3061_p9 = scmp.ne.s32.totalorder %s3567_s22, %s3060_s5  ;;  %p3069_p1 = scmp.lt.s32.totalorder %s3060_s5, %s3060_s5 }
  0x8a   : > { %p3063_p10 = pnand %p3061_p9, %p3049_p6  ;;  %p3070_p0 = por %p3069_p1, %p3068_p11 }
  0x8c   : > { %p3064_p3 = pneg %p3063_p10 }
  0x8e   : > { %p3071_p12 = pnand %p3070_p0, %p3064_p3 }
  0x90   : > { %3074 = shalt.err (!%p3071_p12)
}
  0x91   : > { %s3296_s7 = smov 64   ;;  %s3297_s8 = smov 4  }
  0x92   : > { %2794 = dma.hbm_to_vmem [thread:$0]  (!%p3573_p13), %s4036_s0, 128, %s3567_s22, [#allocation6], %s3296_s7, %s3296_s7, %s3297_s8  }
  0x93   : > { %s3075_s1 = scalar_lea.hbm %s4048_s12, 16 }
  0x94   : > { %p3076_p11 = scmp.ne.s32.totalorder %s4048_s12, %s3075_s1  ;;  %p3082_p4 = scmp.lt.u32.totalorder %s3075_s1, %s4048_s12 }
  0x96   : > { %p3078_p3 = pnand %p3076_p11, %p3049_p6 }
  0x98   : > { %p3079_p12 = pneg %p3078_p3 }
  0x9a   : > { %p3084_p2 = pnand %p3082_p4, %p3079_p12 }
  0x9c   : > { %3087 = shalt.err (!%p3084_p2)
}
  0x9d   : > { %s3088_s22 = scalar_lea.vmem %s3577_s14, 16  ;;  %s3095_s4 = scalar_lea.vmem %s3577_s14, 32 }
  0x9e   : > { %p3089_p7 = scmp.ne.s32.totalorder %s3577_s14, %s3088_s22  ;;  %p3096_p1 = scmp.lt.s32.totalorder %s3577_s14, %s3577_s14 }
  0x9f   : > { %p3097_p0 = scmp.lt.s32.totalorder %s3095_s4, %s3088_s22 }
  0xa0   : > { %p3091_p9 = pnand %p3089_p7, %p3049_p6 }
  0xa1   : > { %p3098_p11 = por %p3097_p0, %p3096_p1 }
  0xa2   : > { %p3092_p10 = pneg %p3091_p9 }
  0xa4   : > { %p3099_p3 = pnand %p3098_p11, %p3092_p10 }
  0xa6   : > { %3102 = shalt.err (!%p3099_p3)
}
  0xa7   : > { %2797 = dma.hbm_to_vmem [thread:$0]  (!%p3573_p13), %s4048_s12, 16, %s3577_s14, [#allocation18]  }
  0xa8   : > { %s3103_s8 = scalar_lea.hbm %s3583_s13, 16  ;;  %s3108_s18 = scalar_lea.hbm %s4038_s2, 32 }
  0xa9   : > { %p3104_p6 = scmp.ne.s32.totalorder %s3583_s13, %s3103_s8  ;;  %p3109_p2 = scmp.lt.u32.totalorder %s3583_s13, %s4038_s2 }
  0xaa   : > { %p3110_p7 = scmp.lt.u32.totalorder %s3108_s18, %s3103_s8  ;;  %p3112_p10 = scmp.lt.u32.totalorder %s3103_s8, %s3583_s13 }
  0xab   : > { %p3106_p12 = pnand %p3104_p6, %p3470_p8 }
  0xac   : > { %p3111_p9 = por %p3110_p7, %p3109_p2 }
  0xad   : > { %p3107_p4 = pneg %p3106_p12 }
  0xae   : > { %p3113_p1 = por %p3112_p10, %p3111_p9 }
  0xb0   : > { %p3114_p0 = pnand %p3113_p1, %p3107_p4 }
  0xb2   : > { %3117 = shalt.err (!%p3114_p0)
}
  0xb3   : > { %s3118_s14 = scalar_lea.vmem %s527_s20, 16  ;;  %s3298_s1 = smov [#allocation10]  }
  0xb4   : > { %p3119_p13 = scmp.ne.s32.totalorder %s527_s20, %s3118_s14  ;;  %s3123_s15 = sshll.u32 %s3298_s1, 4  ;;  %s3124_s15 = int_to_ptr.vmem [resolvable:$false] %s3123_s15 }
  0xb5   : > { %s3125_s5 = scalar_lea.vmem %s3124_s15, 32  ;;  %p3126_p6 = scmp.lt.s32.totalorder %s527_s20, %s3124_s15 }
  0xb6   : > { %p3121_p11 = pnand %p3119_p13, %p3470_p8  ;;  %p3127_p12 = scmp.lt.s32.totalorder %s3125_s5, %s3118_s14 }
  0xb8   : > { %p3122_p3 = pneg %p3121_p11  ;;  %p3128_p5 = por %p3127_p12, %p3126_p6 }
  0xba   : > { %p3129_p2 = pnand %p3128_p5, %p3122_p3 }
  0xbc   : > { %3132 = shalt.err (!%p3129_p2)
}
  0xbd   : > { %p4092_p7 = scmp.ne.s32.totalorder %s4080_s26, 0  ;;  %s4093_s22 = scalar_lea.sflag [#allocation9], %s3441_s27 }
  0xbe   : > { %s3665_s7 = scalar_lea.hbm %s4042_s6, %s3447_s29  ;;  %s569_s8 = scalar_lea.vmem [#allocation13], %s3444_s28 }
  0xbf   : > { %2804 = dma.hbm_to_vmem [thread:$0]  (!%p4092_p7), %s3583_s13, 16, %s527_s20, %s4093_s22  }
  0xc0   : > { %s576_s9 = sshll.u32 %s569_s8, 4  ;;  %s3133_s23 = scalar_lea.hbm %s3665_s7, 16  ;;  %s577_s9 = int_to_ptr.vmem [resolvable:$true] %s576_s9 }
  0xc1   : > { %p3134_p5 = scmp.ne.s32.totalorder %s3665_s7, %s3133_s23  ;;  %s3138_s13 = scalar_lea.hbm %s4042_s6, 32 }
  0xc2   : > { %p3139_p10 = scmp.lt.u32.totalorder %s3665_s7, %s4042_s6  ;;  %p3140_p1 = scmp.lt.u32.totalorder %s3138_s13, %s3133_s23 }
  0xc3   : > { %p3136_p4 = pnand %p3134_p5, %p3470_p8  ;;  %p3142_p13 = scmp.lt.u32.totalorder %s3133_s23, %s3665_s7 }
  0xc4   : > { %p3141_p0 = por %p3140_p1, %p3139_p10 }
  0xc5   : > { %p3137_p9 = pneg %p3136_p4 }
  0xc6   : > { %p3143_p11 = por %p3142_p13, %p3141_p0 }
  0xc8   : > { %p3144_p3 = pnand %p3143_p11, %p3137_p9 }
  0xca   : > { %3147 = shalt.err (!%p3144_p3)
}
  0xcb   : > { %s3148_s14 = scalar_lea.vmem %s577_s9, 16  ;;  %s3299_s1 = smov [#allocation13]  }
  0xcc   : > { %p3149_p6 = scmp.ne.s32.totalorder %s577_s9, %s3148_s14  ;;  %s3153_s15 = sshll.u32 %s3299_s1, 4  ;;  %s3154_s15 = int_to_ptr.vmem [resolvable:$false] %s3153_s15 }
  0xcd   : > { %s3155_s5 = scalar_lea.vmem %s3154_s15, 32  ;;  %p3156_p5 = scmp.lt.s32.totalorder %s577_s9, %s3154_s15 }
  0xce   : > { %p3151_p12 = pnand %p3149_p6, %p3470_p8  ;;  %p3157_p4 = scmp.lt.s32.totalorder %s3155_s5, %s3148_s14 }
  0xd0   : > { %p3152_p2 = pneg %p3151_p12  ;;  %p3158_p7 = por %p3157_p4, %p3156_p5 }
  0xd2   : > { %p3159_p1 = pnand %p3158_p7, %p3152_p2 }
  0xd4   : > { %3162 = shalt.err (!%p3159_p1)
}
  0xd5   : > { %p4094_p10 = scmp.ne.s32.totalorder %s4080_s26, 0  ;;  %s4095_s22 = scalar_lea.sflag [#allocation12], %s3441_s27 }
  0xd6   : > { %s3691_s8 = scalar_lea.hbm %s4046_s10, %s3447_s29  ;;  %s619_s23 = scalar_lea.vmem [#allocation16], %s3444_s28 }
  0xd7   : > { %2810 = dma.hbm_to_vmem [thread:$0]  (!%p4094_p10), %s3665_s7, 16, %s577_s9, %s4095_s22  }
  0xd8   : > { %s626_s18 = sshll.u32 %s619_s23, 4  ;;  %s3163_s11 = scalar_lea.hbm %s3691_s8, 16  ;;  %s627_s18 = int_to_ptr.vmem [resolvable:$true] %s626_s18 }
  0xd9   : > { %p3164_p7 = scmp.ne.s32.totalorder %s3691_s8, %s3163_s11  ;;  %s3168_s7 = scalar_lea.hbm %s4046_s10, 32 }
  0xda   : > { %p3169_p13 = scmp.lt.u32.totalorder %s3691_s8, %s4046_s10  ;;  %p3170_p11 = scmp.lt.u32.totalorder %s3168_s7, %s3163_s11 }
  0xdb   : > { %p3166_p9 = pnand %p3164_p7, %p3470_p8  ;;  %p3172_p6 = scmp.lt.u32.totalorder %s3163_s11, %s3691_s8 }
  0xdc   : > { %p3171_p3 = por %p3170_p11, %p3169_p13 }
  0xdd   : > { %p3167_p0 = pneg %p3166_p9 }
  0xde   : > { %p3173_p12 = por %p3172_p6, %p3171_p3 }
  0xe0   : > { %p3174_p2 = pnand %p3173_p12, %p3167_p0 }
  0xe2   : > { %3177 = shalt.err (!%p3174_p2)
}
  0xe3   : > { %s3178_s28 = scalar_lea.vmem %s627_s18, 16  ;;  %s3300_s29 = smov [#allocation16]  }
  0xe4   : > { %p3179_p5 = scmp.ne.s32.totalorder %s627_s18, %s3178_s28  ;;  %s3183_s14 = sshll.u32 %s3300_s29, 4  ;;  %s3184_s14 = int_to_ptr.vmem [resolvable:$false] %s3183_s14 }
  0xe5   : > { %s3185_s1 = scalar_lea.vmem %s3184_s14, 32  ;;  %p3186_p7 = scmp.lt.s32.totalorder %s627_s18, %s3184_s14 }
  0xe6   : > { %p3181_p4 = pnand %p3179_p5, %p3470_p8  ;;  %p3187_p9 = scmp.lt.s32.totalorder %s3185_s1, %s3178_s28 }
  0xe8   : > { %p3182_p1 = pneg %p3181_p4  ;;  %p3188_p10 = por %p3187_p9, %p3186_p7 }
  0xea   : > { %p3189_p11 = pnand %p3188_p10, %p3182_p1 }
  0xec   : > { %3192 = shalt.err (!%p3189_p11)
}
  0xed   : > { %p4096_p13 = scmp.ne.s32.totalorder %s4080_s26, 0  ;;  %s4097_s15 = scalar_lea.sflag [#allocation15], %s3441_s27 }
  0xee   : > { %p4098_p0 = scmp.ne.s32.totalorder %s4090_s17, 0 }
  0xef   : > { %2816 = dma.hbm_to_vmem [thread:$0]  (!%p4096_p13), %s3691_s8, 16, %s627_s18, %s4097_s15  }
  0xf0   : > { %635 = sbr.rel (%p4098_p0) target bundleno = 5004 (0x138c), region = 80  ;;  %p4099_p8 = scmp.eq.s32.totalorder (!%p4098_p0), %s3550_s24, 0 }
  0xf7   : > { %3244 = dma.done.wait (%p4099_p8), [#allocation6], 128   ;;  %p4100_p3 = pmov %p4099_p8 }
  0xf8   : > { %s641_s16 = sand.u32 1, %s3550_s24   ;;  %s3721_s5 = sand.u32 1, %s3273_s19  }
  0xf9   : > { %3246 = vsyncadd (%p4100_p3), [#allocation6], 4294967168  ;;  %s642_s26 = scalar_lea.sflag [#allocation9], %s641_s16  ;;  %s644_s27 = scalar_lea.vmem [#allocation8], %s3721_s5 }
  0xfa   : > { %p4101_p10 = scmp.ne.s32.totalorder %s4089_s30, 0 }
  0xfc   : > { %3248 = dma.done.wait (%p4101_p10), %s642_s26, 32  }
  0xfd   : > { %3250 = vsyncadd (%p4101_p10), %s642_s26, 4294967264  ;;  %s652_s17 = scalar_lea.vmem [#allocation10], %s3721_s5  ;;  %s658_s22 = scalar_lea.sflag [#allocation12], %s641_s16 }
  0xfe   : > { %s660_s4 = scalar_lea.vmem [#allocation11], %s3721_s5 }
  0xff   : > { %3252 = dma.done.wait (%p4101_p10), %s658_s22, 32  }
 0x100   : > { %3254 = vsyncadd (%p4101_p10), %s658_s22, 4294967264  ;;  %s674_s8 = scalar_lea.sflag [#allocation15], %s641_s16 }
 0x101   : > { %3256 = dma.done.wait (%p4101_p10), %s674_s8, 32  }
 0x102   : > { %3258 = vsyncadd (%p4101_p10), %s674_s8, 4294967264  ;;  %p4102_p6 = pmov %p4100_p3 }
 0x103   : > { %p4103_p12 = pmov %p4100_p3 }
 0x104   : > { %3260 = dma.done.wait (%p4102_p6), [#allocation18], 16  }
 0x105   : > { %3262 = vsyncadd (%p4103_p12), [#allocation18], 4294967280  ;;  %p770_p2 = scmp.lt.s32.totalorder %s3281_s21, 1  ;;  %s4104_s25 = sld [smem:[#allocation32_spill]] }
 0x106   : > { %s4105_s14 = sld [smem:[#allocation33_spill]]  ;;  %s4106_s26 = sld [smem:[#allocation35_spill]] }
 0x107   : > { %s771_s11 = scalar_select %p770_p2, %s3281_s21, 1 }
 0x108   : > { %s4107_s23 = sld [smem:[#allocation37_spill]]  ;;  %p2514_p5 = scmp.ne.s32.totalorder %s3281_s21, 0 }
 0x109   : > { %s2570_s13 = sshll.u32 %s771_s11, 4  ;;  %s2573_s20 = sshll.u32 %s771_s11, 5  ;;  %v2575_v0 = vld [vmem:[#allocation5] sm:$0xff] (!%p2514_p5)   ;;  %vm799_vm0 = vcmask (!%p2514_p5), 261120  }
 0x10a   : > { %794 = sbr.rel (%p2514_p5) target bundleno = 273 (0x111), region = 116  ;;  %v2576_v1 = vunpack.c.l.bf16 (!%p2514_p5), %v2575_v0  ;;  %v2577_v2 = vunpack.c.h.bf16 (!%p2514_p5), %v2575_v0 }
 0x10b   : > { %s3750_s28 = scalar_lea.vmem %s4104_s25, %s2570_s13 }
 0x10c   : > { %s3755_s1 = scalar_lea.vmem %s4105_s14, %s2570_s13  ;;  %s3760_s22 = scalar_lea.vmem %s4106_s26, %s2570_s13  ;;  %800 = vst.msk [vmem:[#allocation2] sm:$0xff] (!%p2514_p5), %vm799_vm0, %v2576_v1  ;;  %801 = vst.msk [vmem:[#allocation2 + $0x8] sm:$0xff] (!%p2514_p5), %vm799_vm0, %v2577_v2 }
 0x10e   : > { %s3765_s3 = scalar_lea.vmem %s4107_s23, %s2573_s20 }
 0x111 PF: > { %vm806_vm1 = vcmask 261120   ;;  %v2895_v17 = vld [vmem:[%s3750_s28] sm:$0xff]   ;;  %v3301_v18 = vmov 0.0   ;;  %v2896_v19 = vld [vmem:[%s3750_s28 + $0x8] sm:$0xff]   ;;  %vm3302_vm2 = vmmov 0   ;;  %vm912_vm3 = vcmask 785408  }
 0x112   : > { %2627 = vmatprep.subr.bf16.mxu0 %v3301_v18  ;;  %2635 = vmatprep.subr.bf16.mxu1 %v3301_v18  ;;  %v2515_v28 = vld [vmem:[%s644_s27] ss:$0 sm:$0xff]  ;;  %s3303_s27 = smov 96   ;;  %vm922_vm4 = vcmask 64512   ;;  %s3305_s23 = smov 88   ;;  %vm1046_vm5 = vcmask 1043456  }
 0x113   : > { %v3768_v3 = vld [vmem:[#allocation2] sm:$0xff]  ;;  %v3770_v4 = vld [vmem:[#allocation2 + $0x8] sm:$0xff]  ;;  %2628 = vmatpush3.bf16.msra.mxu0 %v2895_v17  ;;  %2631 = vmatprep.mubr.msk.bf16.mxu0 %vm3302_vm2, %v3301_v18  ;;  %s3306_s18 = smov 120   ;;  %s3307_s11 = smov 56   ;;  %vm1371_vm6 = vcmask 130112   ;;  %vm1604_vm7 = vcmask 195712  }
 0x114   : > { %v807_v5 = vsel %vm806_vm1, %v3768_v3, 0.0  ;;  %v810_v6 = vsel %vm806_vm1, %v3770_v4, 0.0  ;;  %2629 = vmatprep.subr.bf16.mxu0 %v3301_v18  ;;  %2637 = vmatprep.mubr.msk.bf16.mxu1 %vm3302_vm2, %v3301_v18  ;;  %v2516_v32 = vld [vmem:[%s652_s17] ss:$0 sm:$0xff]  ;;  %s3304_s17 = smov 64   ;;  %s3308_s13 = smov 80  }
 0x115   : > { %808 = vadd.xlane.f32.xlu0 %v807_v5  ;;  %s3309_s20 = smov 112   ;;  %s3310_s7 = smov 48   ;;  %vm1837_vm8 = vcmask 261312   ;;  %vm2072_vm9 = vcmask 523264  }
 0x116   : > { %s3311_s9 = smov 72   ;;  %s3312_s25 = smov 104  }
 0x117   : > { %2630 = vmatpush3.bf16.msra.mxu0 %v2896_v19  ;;  %s3313_s28 = smov 40   ;;  %s3314_s30 = smov 8  }
 0x118   : > { %2641 = vmatprep.subr.bf16.mxu0 %v3301_v18  ;;  %s3315_s29 = smov 16   ;;  %s3316_s14 = smov 24  }
 0x119   : > { %811 = vadd.xlane.f32.xlu0 %v810_v6  ;;  %p2559_p4 = scmp.ne.s32.totalorder %s3281_s21, 1 }
 0x11a   : > { %s4111_s15 = sld [smem:[#allocation39_spill]] (!%p2559_p4)  ;;  %vm3318_vm10 = vmmov (!%p2559_p4), 0   ;;  %vm2203_vm11 = vcmask (!%p2559_p4), 1041409  }
 0x1a2   : > { %v809_v7 = vpop.xlane.xlu0 %808 }
 0x1a3   : > { %v814_v8 = vmul.f32 0.03125, %v809_v7 }
 0x1a5   : > { %v816_v9 = vsub.f32 %v3768_v3, %v814_v8 }
 0x1a6   : > { %v812_v10 = vpop.xlane.xlu0 %811 }
 0x1a7   : > { %v815_v11 = vmul.f32 0.03125, %v812_v10  ;;  %v818_v12 = vmul.f32 %v816_v9, %v816_v9 }
 0x1a9   : > { %v817_v13 = vsub.f32 %v3770_v4, %v815_v11  ;;  %v820_v14 = vsel %vm806_vm1, %v818_v12, 0.0 }
 0x1aa   : > { %821 = vadd.xlane.f32.xlu1 %v820_v14 }
 0x1ab   : > { %v819_v15 = vmul.f32 %v817_v13, %v817_v13 }
 0x1ad   : > { %v823_v16 = vsel %vm806_vm1, %v819_v15, 0.0 }
 0x1ae   : > { %824 = vadd.xlane.f32.xlu1 %v823_v16 }
 0x237   : > { %v822_v20 = vpop.xlane.xlu1 %821 }
 0x238   : > { %v826_v21 = vmul.f32 0.03125, %v822_v20 }
 0x23a   : > { %v828_v22 = vadd.f32 1e-05, %v826_v21 }
 0x23b   : > { %v825_v23 = vpop.xlane.xlu1 %824 }
 0x23c   : > { %2907 = vrsqrt.f32 %v828_v22  ;;  %v827_v24 = vmul.f32 0.03125, %v825_v23 }
 0x23e   : > { %v829_v25 = vadd.f32 1e-05, %v827_v24 }
 0x240   : > { %2909 = vrsqrt.f32 %v829_v25 }
 0x246   : > { %v2908_v26 = vpop.eup %2907 }
 0x247   : > { %v832_v27 = vmul.f32 %v2908_v26, %v816_v9 }
 0x249   : > { %v840_v31 = vmul.f32 %v2515_v28, %v832_v27 }
 0x24a   : > { %v2910_v29 = vpop.eup %2909 }
 0x24b   : > { %v833_v30 = vmul.f32 %v2910_v29, %v817_v13  ;;  %v848_v34 = vadd.f32 %v2516_v32, %v840_v31 }
 0x24d   : > { %v841_v33 = vmul.f32 %v2515_v28, %v833_v30 }
 0x24f   : > { %v849_v35 = vadd.f32 %v2516_v32, %v841_v33 }
 0x251   : > { %v850_v36 = vpack.c.bf16 %v849_v35, %v848_v34 }
 0x253   : > { %2632 = vmatmul.mubr.msk.bf16.vlgmr.msra.gmra.mrb[0].mxu0 %vm806_vm1, %v850_v36 }
 0x254   : > { %2643 = vmatprep.mubr.msk.bf16.mxu0 %vm3302_vm2, %v3301_v18 }
 0x326   : > { %v904_v37 = vpop.f32.mrb[0].mxu0 }
 0x327   : > { %v2633_v38 = vpop.f32.mrb[1].mxu0 }
 0x328   : > { %v907_v39 = vpop.f32.mrb[2].mxu0 }
 0x329   : > { %v911_v40 = vpack.c.bf16 %v907_v39, %v904_v37  ;;  %v2634_v41 = vpop.f32.mrb[3].mxu0 }
 0x32b   : > { %913 = vst.msk [vmem:[#allocation3] sm:$0xff] %vm912_vm3, %v911_v40 }
 0x332   : > { %v914_v42 = vld [vmem:[#allocation3] sm:$0xff] }
 0x333   : > { %v3797_v43 = vcombine.high %v914_v42, %v914_v42  ;;  %v3799_v44 = vcombine.low %v914_v42, %v914_v42 }
 0x335   : > { %969 = vrot.lane.b32.xlu1 %v3797_v43, %s3303_s27  ;;  %920 = vrot.lane.b32.xlu0 %v3799_v44, %s3303_s27  ;;  %s4112_s27 = sld [smem:[#allocation38_spill]] (!%p2559_p4) }
 0x3a7   : > { %v970_v45 = vpop.permute.xlu1 %969  ;;  %v921_v46 = vpop.permute.xlu0 %920 }
 0x3a8   : > { %v975_v47 = vsel %vm922_vm4, %v970_v45, 0  ;;  %v927_v48 = vsel %vm922_vm4, %v921_v46, 0 }
 0x3a9   : > { %2636 = vmatpush3.bf16.xpose.msra.mxu1 %v927_v48  ;;  %2642 = vmatpush3.bf16.xpose.msra.mxu0 %v975_v47 }
 0x3aa   : > { %2653 = vmatprep.subr.bf16.mxu0 %v3301_v18  ;;  %2647 = vmatprep.subr.bf16.mxu1 %v3301_v18 }
 0x3b0   : > { %2638 = vmatmul.mubr.msk.bf16.vlgmr.msra.gmra.mrb[0].mxu1 %vm922_vm4, %v3799_v44  ;;  %2644 = vmatmul.mubr.msk.bf16.vlgmr.msra.gmra.mrb[4].mxu0 %vm922_vm4, %v3797_v43 }
 0x3b1   : > { %2649 = vmatprep.mubr.msk.bf16.mxu1 %vm3302_vm2, %v3301_v18  ;;  %2655 = vmatprep.mubr.msk.bf16.mxu0 %vm3302_vm2, %v3301_v18 }
 0x483   : > { %v963_v49 = vpop.f32.mrb[0].mxu1  ;;  %v1011_v50 = vpop.f32.mrb[4].mxu0 }
 0x484   : > { %v2639_v51 = vpop.f32.mrb[1].mxu1  ;;  %v2645_v52 = vpop.f32.mrb[5].mxu0  ;;  %v1017_v53 = vsel %vm922_vm4, %v963_v49, -inf  ;;  %v1020_v54 = vsel %vm922_vm4, %v1011_v50, -inf }
 0x485   : > { %1018 = vmax.xlane.f32.xlu1 %v1017_v53  ;;  %v966_v55 = vpop.f32.mrb[2].mxu1  ;;  %1021 = vmax.xlane.f32.xlu0 %v1020_v54  ;;  %v1014_v56 = vpop.f32.mrb[6].mxu0 }
 0x486   : > { %v2640_v57 = vpop.f32.mrb[3].mxu1  ;;  %v2646_v58 = vpop.f32.mrb[7].mxu0 }
 0x496   : > { %1090 = vrot.lane.b32.xlu1 %v3797_v43, %s3304_s17 }
 0x49a   : > { %1147 = vrot.lane.b32.xlu1 %v3799_v44, %s3305_s23 }
 0x512   : > { %v1019_v59 = vpop.xlane.xlu1 %1018  ;;  %v1022_v60 = vpop.xlane.xlu0 %1021 }
 0x513   : > { %v1023_v61 = vsub.f32 %v963_v49, %v1019_v59  ;;  %v1024_v62 = vsub.f32 %v1011_v50, %v1022_v60 }
 0x515   : > { %v1025_v63 = vmul.f32 1.442695, %v1023_v61  ;;  %v1027_v0 = vmul.f32 1.442695, %v1024_v62 }
 0x516   : > { %v1091_v1 = vpop.permute.xlu1 %1090 }
 0x517   : > { %2911 = vpow2.f32 %v1025_v63  ;;  %v1096_v2 = vsel %vm1046_vm5, %v1091_v1, 0 }
 0x518   : > { %2913 = vpow2.f32 %v1027_v0  ;;  %2654 = vmatpush3.bf16.msra.mxu0 %v1096_v2 }
 0x519   : > { %2665 = vmatprep.subr.bf16.mxu0 %v3301_v18 }
 0x51a   : > { %v1148_v9 = vpop.permute.xlu1 %1147 }
 0x51b   : > { %v1153_v22 = vsel %vm922_vm4, %v1148_v9, 0 }
 0x521   : > { %v2912_v5 = vpop.eup %2911 }
 0x522   : > { %v2914_v6 = vpop.eup %2913  ;;  %v1029_v7 = vsel %vm922_vm4, %v2912_v5, 0.0 }
 0x523   : > { %1030 = vadd.xlane.f32.xlu0 %v1029_v7  ;;  %v1032_v8 = vsel %vm922_vm4, %v2914_v6, 0.0 }
 0x524   : > { %1033 = vadd.xlane.f32.xlu1 %v1032_v8 }
 0x535   : > { %1198 = vrot.lane.b32.xlu1 %v3797_v43, %s3305_s23 }
 0x539   : > { %1196 = vrot.lane.b32.xlu1 %v3797_v43, %s3306_s18  ;;  %1041 = vrot.lane.b32.xlu0 %v3799_v44, %s3304_s17 }
 0x53d   : > { %1145 = vrot.lane.b32.xlu0 %v3799_v44, %s3306_s18  ;;  %s4113_s18 = sld [smem:[#allocation40_spill]] (!%p2559_p4) }
 0x5b0   : > { %v1031_v10 = vpop.xlane.xlu0 %1030 }
 0x5b1   : > { %v1034_v11 = vpop.xlane.xlu1 %1033  ;;  %2915 = vrcp.f32 %v1031_v10 }
 0x5b2   : > { %2917 = vrcp.f32 %v1034_v11 }
 0x5b4   : > { %v1042_v12 = vpop.permute.xlu0 %1041 }
 0x5b5   : > { %v1048_v13 = vsel %vm1046_vm5, %v1042_v12, 0  ;;  %v1199_v19 = vpop.permute.xlu1 %1198 }
 0x5b6   : > { %2648 = vmatpush3.bf16.msra.mxu1 %v1048_v13  ;;  %v1204_v23 = vsel %vm922_vm4, %v1199_v19, 0 }
 0x5b7   : > { %2659 = vmatprep.subr.bf16.mxu1 %v3301_v18 }
 0x5b8   : > { %v1146_v24 = vpop.permute.xlu0 %1145 }
 0x5b9   : > { %v1197_v25 = vpop.permute.xlu1 %1196 }
 0x5bb   : > { %v2916_v14 = vpop.eup %2915 }
 0x5bc   : > { %v2918_v15 = vpop.eup %2917  ;;  %v1037_v16 = vmul.f32 %v2916_v14, %v2912_v5 }
 0x5bd   : > { %v1038_v17 = vmul.f32 %v2918_v15, %v2914_v6 }
 0x5be   : > { %v1039_v20 = vpack.c.bf16 %v1037_v16, %v1037_v16 }
 0x5bf   : > { %v1040_v21 = vpack.c.bf16 %v1038_v17, %v1038_v17 }
 0x5c0   : > { %2650 = vmatmul.mubr.msk.bf16.vlgmr.msra.gmra.mrb[4].mxu1 %vm922_vm4, %v1039_v20 }
 0x5c1   : > { %2656 = vmatmul.mubr.msk.bf16.vlgmr.msra.gmra.mrb[8].mxu0 %vm922_vm4, %v1040_v21  ;;  %2660 = vmatpush3.bf16.xpose.msra.mxu1 %v1153_v22 }
 0x5c2   : > { %2666 = vmatpush3.bf16.xpose.msra.mxu0 %v1204_v23  ;;  %2661 = vmatprep.mubr.msk.bf16.mxu1 %vm3302_vm2, %v3301_v18 }
 0x5c3   : > { %2667 = vmatprep.mubr.msk.bf16.mxu0 %vm3302_vm2, %v3301_v18  ;;  %2677 = vmatprep.subr.bf16.mxu0 %v3301_v18 }
 0x5c4   : > { %2671 = vmatprep.subr.bf16.mxu1 %v3301_v18 }
 0x5c8   : > { %2662 = vmatmul.mubr.msk.bf16.vlgmr.msra.gmra.mrb[8].mxu1 %vm922_vm4, %v1146_v24 }
 0x5c9   : > { %2668 = vmatmul.mubr.msk.bf16.vlgmr.msra.gmra.mrb[12].mxu0 %vm922_vm4, %v1197_v25  ;;  %2673 = vmatprep.mubr.msk.bf16.mxu1 %vm3302_vm2, %v3301_v18 }
 0x5ca   : > { %2679 = vmatprep.mubr.msk.bf16.mxu0 %vm3302_vm2, %v3301_v18 }
 0x693   : > { %v1084_v26 = vpop.f32.mrb[4].mxu1 }
 0x694   : > { %v1132_v27 = vpop.f32.mrb[8].mxu0  ;;  %v2651_v28 = vpop.f32.mrb[5].mxu1 }
 0x695   : > { %v1138_v29 = vpack.c.bf16 %v1132_v27, %v1084_v26  ;;  %v2657_v30 = vpop.f32.mrb[9].mxu0  ;;  %v1087_v31 = vpop.f32.mrb[6].mxu1 }
 0x696   : > { %v1135_v32 = vpop.f32.mrb[10].mxu0  ;;  %v2652_v33 = vpop.f32.mrb[7].mxu1 }
 0x697   : > { %1139 = vst.msk [vmem:[#allocation4] sm:$0xff] %vm922_vm4, %v1138_v29  ;;  %v2658_v34 = vpop.f32.mrb[11].mxu0 }
 0x69b   : > { %v1189_v35 = vpop.f32.mrb[8].mxu1 }
 0x69c   : > { %v1240_v36 = vpop.f32.mrb[12].mxu0  ;;  %v2663_v37 = vpop.f32.mrb[9].mxu1  ;;  %v1246_v38 = vsel %vm922_vm4, %v1189_v35, -inf }
 0x69d   : > { %v2669_v39 = vpop.f32.mrb[13].mxu0  ;;  %1247 = vmax.xlane.f32.xlu0 %v1246_v38  ;;  %v1192_v40 = vpop.f32.mrb[10].mxu1  ;;  %v1249_v41 = vsel %vm922_vm4, %v1240_v36, -inf }
 0x69e   : > { %1250 = vmax.xlane.f32.xlu1 %v1249_v41  ;;  %v1243_v42 = vpop.f32.mrb[14].mxu0  ;;  %v2664_v45 = vpop.f32.mrb[11].mxu1 }
 0x69f   : > { %v2670_v46 = vpop.f32.mrb[15].mxu0 }
 0x6af   : > { %1318 = vrot.lane.b32.xlu1 %v3797_v43, %s3307_s11 }
 0x6b3   : > { %1380 = vrot.lane.b32.xlu1 %v3799_v44, %s3308_s13 }
 0x6b7   : > { %1431 = vrot.lane.b32.xlu1 %v3797_v43, %s3308_s13 }
 0x6bb   : > { %1429 = vrot.lane.b32.xlu1 %v3797_v43, %s3309_s20 }
 0x72a   : > { %v1248_v47 = vpop.xlane.xlu0 %1247 }
 0x72b   : > { %v1252_v48 = vsub.f32 %v1189_v35, %v1248_v47  ;;  %v1251_v49 = vpop.xlane.xlu1 %1250 }
 0x72c   : > { %v1253_v50 = vsub.f32 %v1240_v36, %v1251_v49 }
 0x72d   : > { %v1254_v51 = vmul.f32 1.442695, %v1252_v48 }
 0x72e   : > { %v1256_v52 = vmul.f32 1.442695, %v1253_v50 }
 0x72f   : > { %2919 = vpow2.f32 %v1254_v51  ;;  %v1319_v53 = vpop.permute.xlu1 %1318 }
 0x730   : > { %v1324_v54 = vsel %vm1046_vm5, %v1319_v53, 0  ;;  %2921 = vpow2.f32 %v1256_v52 }
 0x731   : > { %2678 = vmatpush3.bf16.msra.mxu0 %v1324_v54 }
 0x732   : > { %2689 = vmatprep.subr.bf16.mxu0 %v3301_v18 }
 0x733   : > { %v1381_v0 = vpop.permute.xlu1 %1380 }
 0x734   : > { %v1386_v8 = vsel %vm922_vm4, %v1381_v0, 0 }
 0x737   : > { %v1432_v7 = vpop.permute.xlu1 %1431 }
 0x738   : > { %v1437_v10 = vsel %vm922_vm4, %v1432_v7, 0 }
 0x739   : > { %v2920_v55 = vpop.eup %2919 }
 0x73a   : > { %v1258_v56 = vsel %vm922_vm4, %v2920_v55, 0.0  ;;  %v2922_v57 = vpop.eup %2921 }
 0x73b   : > { %1259 = vadd.xlane.f32.xlu0 %v1258_v56  ;;  %v1261_v58 = vsel %vm922_vm4, %v2922_v57, 0.0  ;;  %v1430_v12 = vpop.permute.xlu1 %1429 }
 0x73f   : > { %1262 = vadd.xlane.f32.xlu0 %v1261_v58 }
 0x755   : > { %1270 = vrot.lane.b32.xlu0 %v3799_v44, %s3307_s11 }
 0x759   : > { %1378 = vrot.lane.b32.xlu0 %v3799_v44, %s3309_s20 }
 0x7c8   : > { %v1260_v59 = vpop.xlane.xlu0 %1259 }
 0x7c9   : > { %2923 = vrcp.f32 %v1260_v59 }
 0x7cc   : > { %v1263_v60 = vpop.xlane.xlu0 %1262 }
 0x7cd   : > { %2925 = vrcp.f32 %v1263_v60 }
 0x7d0   : > { %v1271_v61 = vpop.permute.xlu0 %1270 }
 0x7d1   : > { %v1276_v62 = vsel %vm1046_vm5, %v1271_v61, 0 }
 0x7d2   : > { %2672 = vmatpush3.bf16.msra.mxu1 %v1276_v62 }
 0x7d3   : > { %v2924_v63 = vpop.eup %2923  ;;  %2683 = vmatprep.subr.bf16.mxu1 %v3301_v18 }
 0x7d4   : > { %v1266_v1 = vmul.f32 %v2924_v63, %v2920_v55  ;;  %v1379_v11 = vpop.permute.xlu0 %1378 }
 0x7d6   : > { %v1268_v2 = vpack.c.bf16 %v1266_v1, %v1266_v1 }
 0x7d7   : > { %v2926_v5 = vpop.eup %2925 }
 0x7d8   : > { %v1267_v6 = vmul.f32 %v2926_v5, %v2922_v57  ;;  %2674 = vmatmul.mubr.msk.bf16.vlgmr.msra.gmra.mrb[12].mxu1 %vm922_vm4, %v1268_v2 }
 0x7d9   : > { %2685 = vmatprep.mubr.msk.bf16.mxu1 %vm3302_vm2, %v3301_v18 }
 0x7da   : > { %v1269_v9 = vpack.c.bf16 %v1267_v6, %v1267_v6 }
 0x7db   : > { %2684 = vmatpush3.bf16.xpose.msra.mxu1 %v1386_v8 }
 0x7dc   : > { %2680 = vmatmul.mubr.msk.bf16.vlgmr.msra.gmra.mrb[16].mxu0 %vm922_vm4, %v1269_v9  ;;  %2695 = vmatprep.subr.bf16.mxu1 %v3301_v18 }
 0x7dd   : > { %2690 = vmatpush3.bf16.xpose.msra.mxu0 %v1437_v10  ;;  %2691 = vmatprep.mubr.msk.bf16.mxu0 %vm3302_vm2, %v3301_v18 }
 0x7de   : > { %2701 = vmatprep.subr.bf16.mxu0 %v3301_v18 }
 0x7e2   : > { %2686 = vmatmul.mubr.msk.bf16.vlgmr.msra.gmra.mrb[16].mxu1 %vm922_vm4, %v1379_v11 }
 0x7e3   : > { %2697 = vmatprep.mubr.msk.bf16.mxu1 %vm3302_vm2, %v3301_v18 }
 0x7e4   : > { %2692 = vmatmul.mubr.msk.bf16.vlgmr.msra.gmra.mrb[20].mxu0 %vm922_vm4, %v1430_v12 }
 0x7e5   : > { %2703 = vmatprep.mubr.msk.bf16.mxu0 %vm3302_vm2, %v3301_v18 }
 0x8ab   : > { %v3876_v13 = vpop.f32.mrb[12].mxu1 }
 0x8ac   : > { %v2675_v14 = vpop.f32.mrb[13].mxu1 }
 0x8ad   : > { %v1315_v15 = vpop.f32.mrb[14].mxu1 }
 0x8ae   : > { %v2676_v16 = vpop.f32.mrb[15].mxu1 }
 0x8af   : > { %v3878_v17 = vpop.f32.mrb[16].mxu0 }
 0x8b0   : > { %v1366_v19 = vpack.c.bf16 %v3878_v17, %v3876_v13  ;;  %v2681_v20 = vpop.f32.mrb[17].mxu0 }
 0x8b1   : > { %v1363_v21 = vpop.f32.mrb[18].mxu0 }
 0x8b2   : > { %v2682_v22 = vpop.f32.mrb[19].mxu0 }
 0x8b5   : > { %v1422_v23 = vpop.f32.mrb[16].mxu1 }
 0x8b6   : > { %v2687_v24 = vpop.f32.mrb[17].mxu1  ;;  %v1479_v25 = vsel %vm922_vm4, %v1422_v23, -inf }
 0x8b7   : > { %1480 = vmax.xlane.f32.xlu0 %v1479_v25  ;;  %v1425_v26 = vpop.f32.mrb[18].mxu1  ;;  %v1473_v27 = vpop.f32.mrb[20].mxu0 }
 0x8b8   : > { %v2688_v28 = vpop.f32.mrb[19].mxu1  ;;  %v2693_v29 = vpop.f32.mrb[21].mxu0  ;;  %v1482_v30 = vsel %vm922_vm4, %v1473_v27, -inf }
 0x8b9   : > { %1483 = vmax.xlane.f32.xlu1 %v1482_v30  ;;  %v1476_v31 = vpop.f32.mrb[22].mxu0 }
 0x8ba   : > { %v2694_v32 = vpop.f32.mrb[23].mxu0 }
 0x8ca   : > { %1551 = vrot.lane.b32.xlu1 %v3797_v43, %s3310_s7 }
 0x8ce   : > { %1613 = vrot.lane.b32.xlu1 %v3799_v44, %s3311_s9 }
 0x8d2   : > { %1664 = vrot.lane.b32.xlu1 %v3797_v43, %s3311_s9 }
 0x8d6   : > { %1662 = vrot.lane.b32.xlu1 %v3797_v43, %s3312_s25 }
 0x944   : > { %v1481_v33 = vpop.xlane.xlu0 %1480 }
 0x945   : > { %v1485_v34 = vsub.f32 %v1422_v23, %v1481_v33 }
 0x946   : > { %v1484_v35 = vpop.xlane.xlu1 %1483 }
 0x947   : > { %v1487_v36 = vmul.f32 1.442695, %v1485_v34  ;;  %v1486_v37 = vsub.f32 %v1473_v27, %v1484_v35 }
 0x949   : > { %2927 = vpow2.f32 %v1487_v36  ;;  %v1489_v38 = vmul.f32 1.442695, %v1486_v37 }
 0x94a   : > { %v1552_v39 = vpop.permute.xlu1 %1551 }
 0x94b   : > { %2929 = vpow2.f32 %v1489_v38  ;;  %v1557_v40 = vsel %vm1046_vm5, %v1552_v39, 0 }
 0x94c   : > { %2702 = vmatpush3.bf16.msra.mxu0 %v1557_v40 }
 0x94d   : > { %2713 = vmatprep.subr.bf16.mxu0 %v3301_v18 }
 0x94e   : > { %v1614_v52 = vpop.permute.xlu1 %1613 }
 0x94f   : > { %v1619_v58 = vsel %vm922_vm4, %v1614_v52, 0 }
 0x952   : > { %v1665_v57 = vpop.permute.xlu1 %1664 }
 0x953   : > { %v2928_v41 = vpop.eup %2927  ;;  %v1670_v60 = vsel %vm922_vm4, %v1665_v57, 0 }
 0x954   : > { %v1491_v42 = vsel %vm922_vm4, %v2928_v41, 0.0 }
 0x955   : > { %v2930_v45 = vpop.eup %2929  ;;  %1492 = vadd.xlane.f32.xlu0 %v1491_v42 }
 0x956   : > { %v1494_v46 = vsel %vm922_vm4, %v2930_v45, 0.0  ;;  %v1663_v62 = vpop.permute.xlu1 %1662 }
 0x959   : > { %1495 = vadd.xlane.f32.xlu0 %v1494_v46  ;;  %v2900_v46 = vld [vmem:[%s3755_s1 + $0x8] sm:$0xff]  }
 0x96f   : > { %1503 = vrot.lane.b32.xlu0 %v3799_v44, %s3310_s7 }
 0x973   : > { %1611 = vrot.lane.b32.xlu0 %v3799_v44, %s3312_s25 }
 0x9e2   : > { %v1493_v47 = vpop.xlane.xlu0 %1492 }
 0x9e3   : > { %2931 = vrcp.f32 %v1493_v47 }
 0x9e6   : > { %v1496_v48 = vpop.xlane.xlu0 %1495 }
 0x9e7   : > { %2933 = vrcp.f32 %v1496_v48 }
 0x9ea   : > { %v1504_v49 = vpop.permute.xlu0 %1503 }
 0x9eb   : > { %v1509_v50 = vsel %vm1046_vm5, %v1504_v49, 0 }
 0x9ec   : > { %2696 = vmatpush3.bf16.msra.mxu1 %v1509_v50 }
 0x9ed   : > { %v2932_v51 = vpop.eup %2931  ;;  %2707 = vmatprep.subr.bf16.mxu1 %v3301_v18 }
 0x9ee   : > { %v1499_v53 = vmul.f32 %v2932_v51, %v2928_v41  ;;  %v1612_v61 = vpop.permute.xlu0 %1611 }
 0x9f0   : > { %v1501_v54 = vpack.c.bf16 %v1499_v53, %v1499_v53 }
 0x9f1   : > { %v2934_v55 = vpop.eup %2933 }
 0x9f2   : > { %v1500_v56 = vmul.f32 %v2934_v55, %v2930_v45  ;;  %2698 = vmatmul.mubr.msk.bf16.vlgmr.msra.gmra.mrb[20].mxu1 %vm922_vm4, %v1501_v54  ;;  %v2899_v45 = vld [vmem:[%s3755_s1] sm:$0xff]   ;;  %s4108_s1 = scalar_lea.vmem [#allocation13], %s3721_s5 }
 0x9f3   : > { %2709 = vmatprep.mubr.msk.bf16.mxu1 %vm3302_vm2, %v3301_v18 }
 0x9f4   : > { %v1502_v59 = vpack.c.bf16 %v1500_v56, %v1500_v56 }
 0x9f5   : > { %2708 = vmatpush3.bf16.xpose.msra.mxu1 %v1619_v58 }
 0x9f6   : > { %2704 = vmatmul.mubr.msk.bf16.vlgmr.msra.gmra.mrb[24].mxu0 %vm922_vm4, %v1502_v59  ;;  %2719 = vmatprep.subr.bf16.mxu1 %v3301_v18 }
 0x9f7   : > { %2714 = vmatpush3.bf16.xpose.msra.mxu0 %v1670_v60  ;;  %2715 = vmatprep.mubr.msk.bf16.mxu0 %vm3302_vm2, %v3301_v18 }
 0x9f8   : > { %2725 = vmatprep.subr.bf16.mxu0 %v3301_v18 }
 0x9fc   : > { %2710 = vmatmul.mubr.msk.bf16.vlgmr.msra.gmra.mrb[24].mxu1 %vm922_vm4, %v1612_v61 }
 0x9fd   : > { %2721 = vmatprep.mubr.msk.bf16.mxu1 %vm3302_vm2, %v3301_v18 }
 0x9fe   : > { %2716 = vmatmul.mubr.msk.bf16.vlgmr.msra.gmra.mrb[28].mxu0 %vm922_vm4, %v1663_v62 }
 0x9ff   : > { %2727 = vmatprep.mubr.msk.bf16.mxu0 %vm3302_vm2, %v3301_v18 }
 0xac5   : > { %v1545_v63 = vpop.f32.mrb[20].mxu1 }
 0xac6   : > { %v2699_v0 = vpop.f32.mrb[21].mxu1 }
 0xac7   : > { %v1548_v1 = vpop.f32.mrb[22].mxu1 }
 0xac8   : > { %v2700_v2 = vpop.f32.mrb[23].mxu1 }
 0xac9   : > { %v1593_v5 = vpop.f32.mrb[24].mxu0 }
 0xaca   : > { %v1599_v6 = vpack.c.bf16 %v1593_v5, %v1545_v63  ;;  %v2705_v7 = vpop.f32.mrb[25].mxu0 }
 0xacb   : > { %v1596_v8 = vpop.f32.mrb[26].mxu0 }
 0xacc   : > { %v2706_v9 = vpop.f32.mrb[27].mxu0 }
 0xacf   : > { %v1655_v10 = vpop.f32.mrb[24].mxu1 }
 0xad0   : > { %v2711_v11 = vpop.f32.mrb[25].mxu1  ;;  %v1712_v12 = vsel %vm922_vm4, %v1655_v10, -inf }
 0xad1   : > { %1713 = vmax.xlane.f32.xlu0 %v1712_v12  ;;  %v1658_v14 = vpop.f32.mrb[26].mxu1  ;;  %v1706_v15 = vpop.f32.mrb[28].mxu0  ;;  %v2901_v12 = vld [vmem:[%s3760_s22] sm:$0xff]  }
 0xad2   : > { %v2712_v16 = vpop.f32.mrb[27].mxu1  ;;  %v2717_v20 = vpop.f32.mrb[29].mxu0  ;;  %v1715_v21 = vsel %vm922_vm4, %v1706_v15, -inf  ;;  %v2902_v14 = vld [vmem:[%s3760_s22 + $0x8] sm:$0xff]  }
 0xad3   : > { %1716 = vmax.xlane.f32.xlu1 %v1715_v21  ;;  %v1709_v22 = vpop.f32.mrb[30].mxu0 }
 0xad4   : > { %v2718_v23 = vpop.f32.mrb[31].mxu0 }
 0xae4   : > { %1784 = vrot.lane.b32.xlu1 %v3797_v43, %s3313_s28 }
 0xae8   : > { %1368 = vrot.lane.b32.xlu1 %v1366_v19, %s3314_s30 }
 0xaec   : > { %1601 = vrot.lane.b32.xlu1 %v1599_v6, %s3315_s29 }
 0xb5e   : > { %v1714_v24 = vpop.xlane.xlu0 %1713 }
 0xb5f   : > { %v1718_v25 = vsub.f32 %v1655_v10, %v1714_v24 }
 0xb60   : > { %v1717_v26 = vpop.xlane.xlu1 %1716 }
 0xb61   : > { %v1720_v27 = vmul.f32 1.442695, %v1718_v25  ;;  %v1719_v28 = vsub.f32 %v1706_v15, %v1717_v26  ;;  %v2547_v26 = vld [vmem:[%s660_s4] ss:$0 sm:$0xff]  ;;  %s4109_s4 = scalar_lea.vmem [#allocation14], %s3721_s5 }
 0xb63   : > { %2935 = vpow2.f32 %v1720_v27  ;;  %v1722_v29 = vmul.f32 1.442695, %v1719_v28 }
 0xb64   : > { %v1785_v30 = vpop.permute.xlu1 %1784 }
 0xb65   : > { %2937 = vpow2.f32 %v1722_v29  ;;  %v1790_v31 = vsel %vm1046_vm5, %v1785_v30, 0  ;;  %v2548_v30 = vld [vmem:[%s4108_s1] ss:$0 sm:$0xff] }
 0xb66   : > { %2726 = vmatpush3.bf16.msra.mxu0 %v1790_v31 }
 0xb67   : > { %2739 = vmatprep.subr.bf16.mxu0 %v3301_v18 }
 0xb68   : > { %v1369_v43 = vpop.permute.xlu1 %1368 }
 0xb69   : > { %1372 = vst.msk [vmem:[#allocation4] sm:$0xff] %vm1371_vm6, %v1369_v43 }
 0xb6c   : > { %v1602_v13 = vpop.permute.xlu1 %1601 }
 0xb6d   : > { %v2936_v17 = vpop.eup %2935  ;;  %1605 = vst.msk [vmem:[#allocation4] sm:$0xff] %vm1604_vm7, %v1602_v13 }
 0xb6e   : > { %v1724_v19 = vsel %vm922_vm4, %v2936_v17, 0.0 }
 0xb6f   : > { %v2938_v32 = vpop.eup %2937  ;;  %1725 = vadd.xlane.f32.xlu0 %v1724_v19  ;;  %v2903_v19 = vld [vmem:[%s3765_s3] sm:$0xff]  }
 0xb70   : > { %v1727_v33 = vsel %vm922_vm4, %v2938_v32, 0.0 }
 0xb73   : > { %1728 = vadd.xlane.f32.xlu0 %v1727_v33  ;;  %v2905_v33 = vld [vmem:[%s3765_s3 + $0x10] sm:$0xff]  }
 0xb89   : > { %1736 = vrot.lane.b32.xlu0 %v3799_v44, %s3313_s28 }
 0xbfc   : > { %v1726_v34 = vpop.xlane.xlu0 %1725 }
 0xbfd   : > { %2939 = vrcp.f32 %v1726_v34  ;;  %v2906_v34 = vld [vmem:[%s3765_s3 + $0x18] sm:$0xff]  }
 0xc00   : > { %v1729_v35 = vpop.xlane.xlu0 %1728 }
 0xc01   : > { %2941 = vrcp.f32 %v1729_v35  ;;  %v2549_v35 = vld [vmem:[%s4109_s4] ss:$0 sm:$0xff] }
 0xc04   : > { %v1737_v36 = vpop.permute.xlu0 %1736 }
 0xc05   : > { %v1742_v37 = vsel %vm1046_vm5, %v1737_v36, 0 }
 0xc06   : > { %2720 = vmatpush3.bf16.msra.mxu1 %v1742_v37 }
 0xc07   : > { %v2940_v38 = vpop.eup %2939  ;;  %2731 = vmatprep.subr.bf16.mxu1 %v3301_v18 }
 0xc08   : > { %v1732_v39 = vmul.f32 %v2940_v38, %v2936_v17 }
 0xc0a   : > { %v1734_v40 = vpack.c.bf16 %v1732_v39, %v1732_v39 }
 0xc0b   : > { %v2942_v41 = vpop.eup %2941 }
 0xc0c   : > { %v1733_v42 = vmul.f32 %v2942_v41, %v2938_v32  ;;  %2722 = vmatmul.mubr.msk.bf16.vlgmr.msra.gmra.mrb[28].mxu1 %vm922_vm4, %v1734_v40  ;;  %v2904_v32 = vld [vmem:[%s3765_s3 + $0x8] sm:$0xff]   ;;  %s4110_s3 = scalar_lea.vmem [#allocation16], %s3721_s5 }
 0xc0d   : > { %2735 = vmatprep.mubr.msk.bf16.mxu1 %vm3302_vm2, %v3301_v18  ;;  %2732 = vmatpush3.bf16.msra.mxu1 %v2899_v45 }
 0xc0e   : > { %v1735_v44 = vpack.c.bf16 %v1733_v42, %v1733_v42  ;;  %2733 = vmatprep.subr.bf16.mxu1 %v3301_v18 }
 0xc10   : > { %2728 = vmatmul.mubr.msk.bf16.vlgmr.msra.gmra.mrb[32].mxu0 %vm922_vm4, %v1735_v44 }
 0xc11   : > { %2743 = vmatprep.mubr.msk.bf16.mxu0 %vm3302_vm2, %v3301_v18  ;;  %2734 = vmatpush3.bf16.msra.mxu1 %v2900_v46 }
 0xc12   : > { %2747 = vmatprep.subr.bf16.mxu1 %v3301_v18  ;;  %2740 = vmatpush3.bf16.msra.mxu0 %v2901_v12 }
 0xc13   : > { %2741 = vmatprep.subr.bf16.mxu0 %v3301_v18 }
 0xc16   : > { %2742 = vmatpush3.bf16.msra.mxu0 %v2902_v14 }
 0xcdf   : > { %v1778_v47 = vpop.f32.mrb[28].mxu1 }
 0xce0   : > { %v2723_v48 = vpop.f32.mrb[29].mxu1 }
 0xce1   : > { %v1781_v49 = vpop.f32.mrb[30].mxu1 }
 0xce2   : > { %v2724_v50 = vpop.f32.mrb[31].mxu1 }
 0xce3   : > { %v1826_v51 = vpop.f32.mrb[32].mxu0 }
 0xce4   : > { %v1832_v52 = vpack.c.bf16 %v1826_v51, %v1778_v47  ;;  %v2729_v53 = vpop.f32.mrb[33].mxu0 }
 0xce5   : > { %v1829_v54 = vpop.f32.mrb[34].mxu0 }
 0xce6   : > { %1834 = vrot.lane.b32.xlu0 %v1832_v52, %s3316_s14  ;;  %v2730_v55 = vpop.f32.mrb[35].mxu0 }
 0xd58   : > { %v1835_v56 = vpop.permute.xlu0 %1834 }
 0xd59   : > { %1838 = vst.msk [vmem:[#allocation4] sm:$0xff] %vm1837_vm8, %v1835_v56 }
 0xd60   : > { %v1839_v57 = vld [vmem:[#allocation4] sm:$0xff] }
 0xd61   : > { %2736 = vmatmul.mubr.msk.bf16.vlgmr.msra.gmra.mrb[32].mxu1 %vm806_vm1, %v1839_v57 }
 0xd62   : > { %2755 = vmatprep.mubr.msk.bf16.mxu1 %vm3302_vm2, %v3301_v18  ;;  %2748 = vmatpush3.bf16.msra.mxu1 %v2903_v19 }
 0xd63   : > { %2749 = vmatprep.subr.bf16.mxu1 %v3301_v18 }
 0xd66   : > { %2750 = vmatpush3.bf16.msra.mxu1 %v2904_v32 }
 0xd67   : > { %2751 = vmatprep.subr.bf16.mxu1 %v3301_v18 }
 0xd6a   : > { %2752 = vmatpush3.bf16.msra.mxu1 %v2905_v33 }
 0xd6b   : > { %2753 = vmatprep.subr.bf16.mxu1 %v3301_v18 }
 0xd6e   : > { %2754 = vmatpush3.bf16.msra.mxu1 %v2906_v34 }
 0xe34   : > { %v1893_v58 = vpop.f32.mrb[32].mxu1 }
 0xe35   : > { %v3939_v59 = vadd.f32 %v1893_v58, %v3768_v3  ;;  %v2737_v60 = vpop.f32.mrb[33].mxu1 }
 0xe36   : > { %v1896_v61 = vpop.f32.mrb[34].mxu1 }
 0xe37   : > { %v3942_v62 = vadd.f32 %v1896_v61, %v3770_v4  ;;  %v2738_v63 = vpop.f32.mrb[35].mxu1  ;;  %v1904_v0 = vsel %vm806_vm1, %v3939_v59, 0.0 }
 0xe38   : > { %1905 = vadd.xlane.f32.xlu1 %v1904_v0  ;;  %v2553_v63 = vld [vmem:[%s4110_s3] ss:$0 sm:$0xff] }
 0xe39   : > { %v1907_v1 = vsel %vm806_vm1, %v3942_v62, 0.0 }
 0xe3a   : > { %1908 = vadd.xlane.f32.xlu0 %v1907_v1 }
 0xec5   : > { %v1906_v2 = vpop.xlane.xlu1 %1905 }
 0xec6   : > { %v1910_v5 = vmul.f32 0.03125, %v1906_v2 }
 0xec7   : > { %v1909_v3 = vpop.xlane.xlu0 %1908 }
 0xec8   : > { %v1912_v6 = vsub.f32 %v3939_v59, %v1910_v5  ;;  %v1911_v7 = vmul.f32 0.03125, %v1909_v3 }
 0xeca   : > { %v1913_v4 = vsub.f32 %v3942_v62, %v1911_v7  ;;  %v1914_v8 = vmul.f32 %v1912_v6, %v1912_v6 }
 0xecc   : > { %v1916_v9 = vsel %vm806_vm1, %v1914_v8, 0.0  ;;  %v1915_v10 = vmul.f32 %v1913_v4, %v1913_v4 }
 0xecd   : > { %1917 = vadd.xlane.f32.xlu0 %v1916_v9 }
 0xece   : > { %v1919_v11 = vsel %vm806_vm1, %v1915_v10, 0.0 }
 0xed1   : > { %1920 = vadd.xlane.f32.xlu0 %v1919_v11 }
 0xf5a   : > { %v1918_v15 = vpop.xlane.xlu0 %1917 }
 0xf5b   : > { %v1922_v16 = vmul.f32 0.03125, %v1918_v15 }
 0xf5d   : > { %v1924_v20 = vadd.f32 1e-05, %v1922_v16 }
 0xf5e   : > { %v1921_v21 = vpop.xlane.xlu0 %1920 }
 0xf5f   : > { %2943 = vrsqrt.f32 %v1924_v20  ;;  %v1923_v22 = vmul.f32 0.03125, %v1921_v21 }
 0xf61   : > { %v1925_v23 = vadd.f32 1e-05, %v1923_v22  ;;  %v2951_v22 = vld [vmem:[%s4111_s15] sm:$0xff] (!%p2559_p4)  }
 0xf63   : > { %2945 = vrsqrt.f32 %v1925_v23  ;;  %v3317_v23 = vmov (!%p2559_p4), 0.0  }
 0xf64   : > { %2759 = vmatprep.subr.bf16.mxu0 (!%p2559_p4), %v3317_v23 }
 0xf69   : > { %v2944_v24 = vpop.eup %2943 }
 0xf6a   : > { %v1928_v25 = vmul.f32 %v2944_v24, %v1912_v6  ;;  %v2952_v24 = vld [vmem:[%s4111_s15 + $0x8] sm:$0xff] (!%p2559_p4)  }
 0xf6c   : > { %v1936_v28 = vmul.f32 %v2547_v26, %v1928_v25 }
 0xf6d   : > { %v2946_v27 = vpop.eup %2945 }
 0xf6e   : > { %v1929_v29 = vmul.f32 %v2946_v27, %v1913_v4  ;;  %v1944_v43 = vadd.f32 %v2548_v30, %v1936_v28 }
 0xf70   : > { %v1937_v31 = vmul.f32 %v2547_v26, %v1929_v29 }
 0xf72   : > { %v1945_v13 = vadd.f32 %v2548_v30, %v1937_v31 }
 0xf74   : > { %v1946_v17 = vpack.c.bf16 %v1945_v13, %v1944_v43  ;;  %v2560_v43 = vld [vmem:[%s4112_s27] ss:$0 sm:$0xff] (!%p2559_p4) }
 0xf76   : > { %2744 = vmatmul.mubr.msk.bf16.vlgmr.msra.gmra.mrb[36].mxu0 %vm806_vm1, %v1946_v17  ;;  %v2561_v17 = vld [vmem:[#allocation17] ss:$0 sm:$0xff] (!%p2559_p4) }
 0xf77   : > { %2763 = vmatprep.mubr.msk.bf16.mxu0 (!%p2559_p4), %vm3318_vm10, %v3317_v23  ;;  %2760 = vmatpush3.bf16.msra.mxu0 (!%p2559_p4), %v2951_v22 }
 0xf78   : > { %2761 = vmatprep.subr.bf16.mxu0 (!%p2559_p4), %v3317_v23 }
 0xf7b   : > { %2762 = vmatpush3.bf16.msra.mxu0 (!%p2559_p4), %v2952_v24 }
0x1049   : > { %v2007_v36 = vpop.f32.mrb[36].mxu0 }
0x104a   : > { %v2008_v37 = vadd.f32 %v2549_v35, %v2007_v36  ;;  %v2745_v38 = vpop.f32.mrb[37].mxu0 }
0x104b   : > { %v2010_v39 = vpop.f32.mrb[38].mxu0 }
0x104c   : > { %v2014_v40 = vmul.f32 %v2008_v37, %v2008_v37  ;;  %v2011_v41 = vadd.f32 %v2549_v35, %v2010_v39  ;;  %v2746_v42 = vpop.f32.mrb[39].mxu0 }
0x104e   : > { %v2016_v44 = vmul.f32 %v2014_v40, %v2008_v37  ;;  %v2015_v45 = vmul.f32 %v2011_v41, %v2011_v41 }
0x1050   : > { %v2018_v46 = vmul.f32 0.044715, %v2016_v44  ;;  %v2017_v47 = vmul.f32 %v2015_v45, %v2011_v41 }
0x1052   : > { %v2020_v48 = vadd.f32 %v2018_v46, %v2008_v37  ;;  %v2019_v49 = vmul.f32 0.044715, %v2017_v47 }
0x1054   : > { %v2022_v50 = vmul.f32 0.7978846, %v2020_v48  ;;  %v2021_v18 = vadd.f32 %v2019_v49, %v2011_v41 }
0x1056   : > { %2947 = vtanh.f32 %v2022_v50  ;;  %v2023_v51 = vmul.f32 0.7978846, %v2021_v18 }
0x1058   : > { %2949 = vtanh.f32 %v2023_v51 }
0x1060   : > { %v2948_v52 = vpop.eup %2947 }
0x1061   : > { %v2026_v53 = vadd.f32 1.0, %v2948_v52 }
0x1062   : > { %v2950_v54 = vpop.eup %2949 }
0x1063   : > { %v2028_v55 = vmul.f32 0.5, %v2026_v53  ;;  %v2027_v56 = vadd.f32 1.0, %v2950_v54 }
0x1065   : > { %v2029_v57 = vmul.f32 0.5, %v2027_v56  ;;  %v2030_v58 = vmul.f32 %v2028_v55, %v2008_v37 }
0x1067   : > { %v2031_v60 = vmul.f32 %v2029_v57, %v2011_v41 }
0x1069   : > { %v2032_v61 = vpack.c.bf16 %v2031_v60, %v2030_v58  ;;  %v2562_v60 = vld [vmem:[%s4113_s18] ss:$0 sm:$0xff] (!%p2559_p4) }
0x106b   : > { %2756 = vmatmul.mubr.msk.bf16.vlgmr.msra.gmra.mrb[36].mxu1 %vm2072_vm9, %v2032_v61 }
0x113e   : > { %v2110_v0 = vpop.f32.mrb[36].mxu1 }
0x113f   : > { %v2111_v1 = vadd.f32 %v2553_v63, %v2110_v0  ;;  %v2757_v2 = vpop.f32.mrb[37].mxu1  ;;  %2124 = sbr.rel (%p2559_p4) target bundleno = 4973 (0x136d), region = 120 }
0x1140   : > { %v2113_v5 = vpop.f32.mrb[38].mxu1 }
0x1141   : > { %v2117_v3 = vadd.f32 %v2111_v1, %v3939_v59  ;;  %v2114_v6 = vadd.f32 %v2553_v63, %v2113_v5  ;;  %v2758_v7 = vpop.f32.mrb[39].mxu1 }
0x1143   : > { %2119 = vst.msk [vmem:[#allocation2] sm:$0xff] %vm806_vm1, %v2117_v3  ;;  %v2118_v4 = vadd.f32 %v2114_v6, %v3942_v62  ;;  %v2127_v8 = vsel (!%p2559_p4), %vm806_vm1, %v2117_v3, 0.0 }
0x1144   : > { %2128 = vadd.xlane.f32.xlu0 (!%p2559_p4), %v2127_v8 }
0x1145   : > { %2120 = vst.msk [vmem:[#allocation2 + $0x8] sm:$0xff] %vm806_vm1, %v2118_v4  ;;  %v2130_v9 = vsel (!%p2559_p4), %vm806_vm1, %v2118_v4, 0.0 }
0x1148   : > { %2131 = vadd.xlane.f32.xlu0 %v2130_v9 }
0x11d1   : > { %v2129_v10 = vpop.xlane.xlu0 %2128 }
0x11d2   : > { %v2133_v11 = vmul.f32 0.03125, %v2129_v10 }
0x11d4   : > { %v2135_v59 = vsub.f32 %v2117_v3, %v2133_v11 }
0x11d5   : > { %v2132_v12 = vpop.xlane.xlu0 %2131 }
0x11d6   : > { %v2134_v14 = vmul.f32 0.03125, %v2132_v12  ;;  %v2137_v15 = vmul.f32 %v2135_v59, %v2135_v59 }
0x11d8   : > { %v2136_v16 = vsub.f32 %v2118_v4, %v2134_v14  ;;  %v2139_v62 = vsel %vm806_vm1, %v2137_v15, 0.0 }
0x11d9   : > { %2140 = vadd.xlane.f32.xlu1 %v2139_v62 }
0x11da   : > { %v2138_v20 = vmul.f32 %v2136_v16, %v2136_v16 }
0x11dc   : > { %v2142_v21 = vsel %vm806_vm1, %v2138_v20, 0.0 }
0x11dd   : > { %2143 = vadd.xlane.f32.xlu1 %v2142_v21 }
0x1266   : > { %v2141_v25 = vpop.xlane.xlu1 %2140 }
0x1267   : > { %v2145_v26 = vmul.f32 0.03125, %v2141_v25 }
0x1269   : > { %v2147_v27 = vadd.f32 1e-05, %v2145_v26 }
0x126a   : > { %v2144_v28 = vpop.xlane.xlu1 %2143 }
0x126b   : > { %2953 = vrsqrt.f32 %v2147_v27  ;;  %v2146_v29 = vmul.f32 0.03125, %v2144_v28 }
0x126d   : > { %v2148_v30 = vadd.f32 1e-05, %v2146_v29 }
0x126f   : > { %2955 = vrsqrt.f32 %v2148_v30 }
0x1275   : > { %v2954_v31 = vpop.eup %2953 }
0x1276   : > { %v2151_v13 = vmul.f32 %v2954_v31, %v2135_v59 }
0x1278   : > { %v2159_v19 = vmul.f32 %v2560_v43, %v2151_v13 }
0x1279   : > { %v2956_v32 = vpop.eup %2955 }
0x127a   : > { %v2152_v33 = vmul.f32 %v2956_v32, %v2136_v16  ;;  %v2167_v34 = vadd.f32 %v2561_v17, %v2159_v19 }
0x127c   : > { %v2160_v35 = vmul.f32 %v2560_v43, %v2152_v33  ;;  %v2169_v36 = vsel %vm806_vm1, %v2167_v34, 0.0 }
0x127d   : > { %v2170_v37 = vrot.slane %v2169_v36, 4 }
0x127e   : > { %v2168_v38 = vadd.f32 %v2561_v17, %v2160_v35 }
0x127f   : > { %v2171_v39 = vadd.f32 %v2170_v37, %v2169_v36 }
0x1280   : > { %v2176_v40 = vsel %vm806_vm1, %v2168_v38, 0.0 }
0x1281   : > { %v2172_v41 = vrot.slane %v2171_v39, 2  ;;  %v2177_v42 = vrot.slane %v2176_v40, 4 }
0x1283   : > { %v2173_v44 = vadd.f32 %v2172_v41, %v2171_v39  ;;  %v2178_v45 = vadd.f32 %v2177_v42, %v2176_v40 }
0x1285   : > { %v2174_v46 = vrot.slane %v2173_v44, 1  ;;  %v2179_v47 = vrot.slane %v2178_v45, 2 }
0x1287   : > { %v2175_v48 = vadd.f32 %v2174_v46, %v2173_v44  ;;  %v2180_v49 = vadd.f32 %v2179_v47, %v2178_v45 }
0x1289   : > { %v2181_v50 = vrot.slane %v2180_v49, 1  ;;  %v2184_v18 = vmul.f32 0.125, %v2175_v48 }
0x128b   : > { %v2182_v51 = vadd.f32 %v2181_v50, %v2180_v49  ;;  %v2186_v53 = vpack.c.bf16 %v2184_v18, %v2184_v18 }
0x128d   : > { %v2185_v52 = vmul.f32 0.125, %v2182_v51  ;;  %v2201_v55 = vunpack.c.l.b16 %v2186_v53 }
0x128f   : > { %v2187_v54 = vpack.c.bf16 %v2185_v52, %v2185_v52 }
0x1291   : > { %v2202_v56 = vunpack.c.l.b16 %v2187_v54 }
0x1293   : > { %v2204_v57 = vsel %vm2203_vm11, %v2202_v56, %v2201_v55 }
0x1294   : > { %v2205_v58 = vpack.c.b16 %v2204_v57, %v2204_v57 }
0x1296   : > { %2764 = vmatmul.mubr.msk.bf16.vlgmr.msra.gmra.mrb[0].mxu0 %vm806_vm1, %v2205_v58 }
0x1369   : > { %v2255_v61 = vpop.f32.mrb[0].mxu0 }
0x136a   : > { %v2256_v63 = vadd.f32 %v2562_v60, %v2255_v61  ;;  %v2765_v0 = vpop.f32.mrb[1].mxu0 }
0x136b   : > { %v2258_v1 = vpop.f32.mrb[2].mxu0 }
0x136c   : > { %2261 = vst [vmem:[#allocation19] sm:$0x3] %v2256_v63  ;;  %v2766_v2 = vpop.f32.mrb[3].mxu0 }
0x136d PF: > { %p2822_p1 = scmp.eq.s32.totalorder %s3550_s24, 1  ;;  %s3319_s11 = smov [#allocation19]  }
0x136e   : > { %s2271_s13 = sshll.u32 %s3319_s11, 4  ;;  %s2272_s13 = int_to_ptr.vmem [resolvable:$true] %s2271_s13 }
0x136f   : > { %s3193_s20 = scalar_lea.vmem %s2272_s13, 32  ;;  %p3200_p13 = scmp.lt.s32.totalorder %s2272_s13, %s2272_s13 }
0x1370   : > { %p3194_p7 = scmp.ne.s32.totalorder %s2272_s13, %s3193_s20  ;;  %p3201_p0 = scmp.lt.s32.totalorder %s3193_s20, %s3193_s20 }
0x1372   : > { %p3195_p9 = pnand %p3194_p7, %p2822_p1  ;;  %p3202_p8 = por %p3201_p0, %p3200_p13 }
0x1374   : > { %p3196_p11 = pneg %p3195_p9 }
0x1376   : > { %p3203_p3 = pnand %p3202_p8, %p3196_p11 }
0x1378   : > { %3206 = shalt.err (!%p3203_p3)
}
0x1379   : > { %s4114_s25 = sld [smem:[#allocation41_spill]] }
0x137f   : > { %s3207_s28 = scalar_lea.hbm %s4114_s25, 32 }
0x1380   : > { %p3208_p10 = scmp.ne.s32.totalorder %s4114_s25, %s3207_s28  ;;  %p3213_p2 = scmp.lt.u32.totalorder %s3207_s28, %s4114_s25 }
0x1382   : > { %p3209_p6 = pnand %p3208_p10, %p2822_p1 }
0x1384   : > { %p3210_p12 = pneg %p3209_p6 }
0x1386   : > { %p3215_p5 = pnand %p3213_p2, %p3210_p12 }
0x1388   : > { %3218 = shalt.err (!%p3215_p5)
}
0x1389   : > { %2788 = dma.vmem_to_hbm [thread:$0]  (%p2822_p1), %s2272_s13, 32, %s4114_s25, [#allocation7]  }
0x138a   : > { %3264 = dma.done.wait (%p2822_p1), [#allocation7], 32  }
0x138b   : > { %3266 = vsyncadd (%p2822_p1), [#allocation7], 4294967264 }
0x138c PF: > { %s4115_s21 = sld [smem:[#allocation28_spill]]  ;;  %s4116_s5 = sld [smem:[#allocation26_spill]] }
0x138d   : > { %s4117_s20 = sld [smem:[#allocation30_spill]]  ;;  %s4119_s22 = sld [smem:[#allocation29_spill]] }
0x138e   : > { %s4120_s18 = smov %s3273_s19 }
0x1392   : > { %s37_s23 = sadd.s32 1, %s4115_s21   ;;  %s4118_s21 = sld [smem:[#allocation27_spill]] }
0x1393   : > { %p34_p4 = scmp.ge.s32.totalorder %s37_s23, 4   ;;  %s4121_s19 = smov %s4116_s5 }
0x1395   :  { %36 = sbr.rel (!%p34_p4) target bundleno = 23 (0x17), region = 207 }
0x139c   :  { %2284 = vsyncpa [#allocation6], 1 }
0x139d   :  { %2286 = vsyncpa [#allocation6 + $0x1], 1 }
0x139e   :  { %2287 = vsyncpa [#allocation9], 1 }
0x139f   :  { %2289 = vsyncpa [#allocation9 + $0x1], 1 }
0x13a0   :  { %2290 = vsyncpa [#allocation12], 1 }
0x13a1   :  { %2292 = vsyncpa [#allocation12 + $0x1], 1 }
0x13a2   :  { %2293 = vsyncpa [#allocation15], 1 }
0x13a3   :  { %2295 = vsyncpa [#allocation15 + $0x1], 1 }
0x13a4   :  { %2296 = vsyncpa [#allocation18], 1 }
0x13a5   :  { %2297 = vsyncpa [#allocation7], 1 }
0x13a6   :  { %2299 = vsyncpa [#allocation7 + $0x1], 1 }

</bundles_post_ra>
